<compile_context>
chip_gen: v6e
topology: v6e:2x2x1
jax: 0.10.0
libtpu: 0.0.40
codegen_flags: <defaults>
</compile_context>

<pallas_src>
import jax
import jax.numpy as jnp
from jax import lax
from jax.experimental import pallas as pl
from jax.experimental.pallas import tpu as pltpu

GATE_TILE = 128  # each LSTM gate gets its own 128-lane tile


def bio_mlp_lstm_kernel(x_ref, w_fused_ref, b_fused_ref, w_hh_ref,
                        w_lin_ref, b_lin_ref, out_ref, xg_ref):
    T, BP, F = x_ref.shape
    GT = w_hh_ref.shape[0]          # 128: padded hidden width == gate tile
    G = w_hh_ref.shape[1]           # 4 * GT

    # ---- fused (MLP ∘ LSTM-input-projection) matmul, all timesteps at once.
    # Staged into VMEM scratch so the unrolled recurrence reads one
    # (BP, 4*GT) slab per step instead of pinning (T, BP, 4*GT) in vregs.
    x_flat = x_ref[...].reshape(T * BP, F)
    xg = jnp.dot(x_flat, w_fused_ref[...],
                 preferred_element_type=jnp.float32) + b_fused_ref[...]
    xg_ref[...] = xg.reshape(T, BP, G)

    w_hh = w_hh_ref[...]            # bf16 (GT, 4*GT), pre-cast in wrapper

    # ---- sequential LSTM recurrence.
    # Gate column order is [i, f, o, g] (reordered at prep time), each gate on
    # its own 128-lane tile, so the slices below are whole-vreg picks and the
    # sigmoids run as one contiguous EUP pass.
    def step(t, carry):
        h, c = carry
        gates = xg_ref[t] + jnp.dot(h.astype(jnp.bfloat16), w_hh,
                                    preferred_element_type=jnp.float32)
        sig = jax.nn.sigmoid(gates[:, :3 * GT])
        i = sig[:, 0 * GT:1 * GT]
        f = sig[:, 1 * GT:2 * GT]
        o = sig[:, 2 * GT:3 * GT]
        g = jnp.tanh(gates[:, 3 * GT:])
        c_new = f * c + i * g
        h_new = o * jnp.tanh(c_new)
        return h_new, c_new

    h0 = jnp.zeros((BP, GT), jnp.float32)
    c0 = jnp.zeros((BP, GT), jnp.float32)
    h_last, _ = lax.fori_loop(0, T, step, (h0, c0), unroll=True)

    # ---- final classifier + log_softmax over classes (padded h lanes are 0,
    # padded w_lin rows are 0, so this is exact).
    logits = jnp.dot(h_last, w_lin_ref[...],
                     preferred_element_type=jnp.float32) + b_lin_ref[...]
    m = jnp.max(logits, axis=1, keepdims=True)
    lse = m + jnp.log(jnp.sum(jnp.exp(logits - m), axis=1, keepdims=True))
    out_ref[...] = logits - lse


def prepare_params(params, *, hidden_size, gate_tile=GATE_TILE):
    """Fuse the two pre-LSTM linears, reorder gates to [i,f,o,g], lane-pad."""
    H, GT = hidden_size, gate_tile
    w_mlp, b_mlp = params["w_mlp"], params["b_mlp"]      # (F, E), (1, E)
    w_ih, w_hh = params["w_ih"], params["w_hh"]          # (E, 4H), (H, 4H)
    b_lstm = params["b_lstm"]                            # (1, 4H)

    # Exact fusion of the two stacked linears (no nonlinearity between them).
    w_fused = w_mlp @ w_ih                               # (F, 4H)
    b_fused = b_mlp @ w_ih + b_lstm                      # (1, 4H)

    def relayout_gates(m):
        # PyTorch gate order (i, f, g, o) -> (i, f, o, g), each gate padded
        # from H to GT lanes so it occupies its own 128-lane tile.
        i, f, g, o = (m[..., k * H:(k + 1) * H] for k in range(4))
        pad = [(0, 0)] * (m.ndim - 1) + [(0, GT - H)]
        return jnp.concatenate([jnp.pad(blk, pad) for blk in (i, f, o, g)],
                               axis=-1)                  # (..., 4*GT)

    w_fused_p = relayout_gates(w_fused)                  # (F, 4*GT)
    b_fused_p = relayout_gates(b_fused)                  # (1, 4*GT)
    w_hh_p = jnp.zeros((GT, 4 * GT), jnp.float32).at[:H].set(relayout_gates(w_hh))
    num_class = params["w_lin"].shape[1]
    w_lin_p = jnp.zeros((GT, num_class), jnp.float32).at[:H].set(params["w_lin"])

    return {
        "w_fused": w_fused_p.astype(jnp.float32),
        "b_fused": b_fused_p.astype(jnp.float32),
        # bf16 MXU operand on the serial per-step critical path.
        "w_hh": w_hh_p.astype(jnp.bfloat16),
        "w_lin": w_lin_p,
        "b_lin": params["b_lin"].astype(jnp.float32),
    }


def bio_mlp_lstm(x, params, *, hidden_size, gate_tile=GATE_TILE):
    """x: (B, F, T) float32, same axis convention as the PyTorch module."""
    B, F, T = x.shape
    num_class = params["w_lin"].shape[1]
    prep = prepare_params(params, hidden_size=hidden_size, gate_tile=gate_tile)

    BP = -(-B // 8) * 8            # pad batch to a full sublane tile
    # TODO(synk): fold this transpose into the kernel (dot_general over F)
    # once B*T grows enough for the extra HBM pass over x to matter.
    x_tm = jnp.transpose(x, (2, 0, 1)).astype(jnp.float32)   # (T, B, F)
    x_tm = jnp.pad(x_tm, ((0, 0), (0, BP - B), (0, 0)))      # (T, BP, F)

    vmem = pl.BlockSpec(memory_space=pltpu.MemorySpace.VMEM)
    out = pl.pallas_call(
        bio_mlp_lstm_kernel,
        out_shape=jax.ShapeDtypeStruct((BP, num_class), jnp.float32),
        in_specs=[vmem] * 6,
        out_specs=vmem,
        scratch_shapes=[pltpu.VMEM((T, BP, 4 * gate_tile), jnp.float32)],
    )(x_tm, prep["w_fused"], prep["b_fused"], prep["w_hh"],
      prep["w_lin"], prep["b_lin"])
    return out[:B]


def init_params(key, *, input_size=19, lstm_input=18, hidden_size=50,
                num_class=20):
    """Deterministic synthetic parameters (PyTorch shapes, stored transposed)."""
    ks = jax.random.split(key, 8)
    scale = 0.1
    return {
        # nn.Linear(input_size, lstm_input): weight (E, F) -> stored (F, E)
        "w_mlp": scale * jax.random.normal(ks[0], (input_size, lstm_input), jnp.float32),
        "b_mlp": scale * jax.random.normal(ks[1], (1, lstm_input), jnp.float32),
        # nn.LSTM weight_ih_l0 (4H, E) -> stored (E, 4H); weight_hh_l0 (4H, H) -> (H, 4H)
        "w_ih": scale * jax.random.normal(ks[2], (lstm_input, 4 * hidden_size), jnp.float32),
        "w_hh": scale * jax.random.normal(ks[3], (hidden_size, 4 * hidden_size), jnp.float32),
        # bias_ih + bias_hh combined
        "b_lstm": scale * (jax.random.normal(ks[4], (1, 4 * hidden_size), jnp.float32)
                           + jax.random.normal(ks[5], (1, 4 * hidden_size), jnp.float32)),
        # nn.Linear(hidden_size, num_class): weight (C, H) -> stored (H, C)
        "w_lin": scale * jax.random.normal(ks[6], (hidden_size, num_class), jnp.float32),
        "b_lin": scale * jax.random.normal(ks[7], (1, num_class), jnp.float32),
    }


def reference_forward(x, params, *, hidden_size):
    """Pure-JAX f32 reference mirroring the PyTorch forward (for validation)."""
    B, F, T = x.shape
    H = hidden_size
    emb = jnp.einsum("bft,fe->bte", x, params["w_mlp"]) + params["b_mlp"][0]  # (B, T, E)
    x_gates = jnp.einsum("bte,eg->btg", emb, params["w_ih"]) + params["b_lstm"][0]

    def step(carry, g_t):
        h, c = carry
        gates = g_t + h @ params["w_hh"]
        i = jax.nn.sigmoid(gates[:, 0 * H:1 * H])
        f = jax.nn.sigmoid(gates[:, 1 * H:2 * H])
        g = jnp.tanh(gates[:, 2 * H:3 * H])
        o = jax.nn.sigmoid(gates[:, 3 * H:4 * H])
        c_new = f * c + i * g
        h_new = o * jnp.tanh(c_new)
        return (h_new, c_new), None

    h0 = jnp.zeros((B, H), jnp.float32)
    c0 = jnp.zeros((B, H), jnp.float32)
    (h_last, _), _ = lax.scan(step, (h0, c0), jnp.transpose(x_gates, (1, 0, 2)))
    logits = h_last @ params["w_lin"] + params["b_lin"][0]
    return jax.nn.log_softmax(logits, axis=1)


if __name__ == "__main__":
    B, input_size, T = 2, 19, 8
    lstm_input, hidden_size, num_class = 18, 50, 20

    key = jax.random.PRNGKey(0)
    kx, kp = jax.random.split(key)
    x = jax.random.normal(kx, (B, input_size, T), jnp.float32)
    params = init_params(kp, input_size=input_size, lstm_input=lstm_input,
                         hidden_size=hidden_size, num_class=num_class)

    out = bio_mlp_lstm(x, params, hidden_size=hidden_size)
    out = jax.block_until_ready(out)

    ref = reference_forward(x, params, hidden_size=hidden_size)
    assert out.shape == (B, num_class)
    # Recurrent matmul uses bf16 MXU operands (per perf review), so validate
    # against the pure-f32 reference with a slightly looser tolerance
    # (observed error is ~1e-3 on the log-probabilities).
    assert jnp.allclose(out, ref, rtol=1e-2, atol=1e-2), (out, ref)

    print("KERNEL_OK")
</pallas_src>

<mosaic_0001>
module attributes {stable_mosaic.version = 11 : i64} {
  func.func @bio_mlp_lstm_kernel(%arg0: memref<8x8x19xf32, #tpu.memory_space<vmem>>, %arg1: memref<19x512xf32, #tpu.memory_space<vmem>>, %arg2: memref<1x512xf32, #tpu.memory_space<vmem>>, %arg3: memref<128x512xbf16, #tpu.memory_space<vmem>>, %arg4: memref<128x20xf32, #tpu.memory_space<vmem>>, %arg5: memref<1x20xf32, #tpu.memory_space<vmem>>, %arg6: memref<8x20xf32, #tpu.memory_space<vmem>>, %arg7: memref<8x8x512xf32, #tpu.memory_space<vmem>>) attributes {dimension_semantics = [], scalar_prefetch = 0 : i64, scratch_operands = 1 : i64, tpu.core_type = #tpu.core_type<tc>} {
    %c0 = arith.constant 0 : index
    %c0_0 = arith.constant 0 : index
    %c0_1 = arith.constant 0 : index
    %0 = vector.load %arg0[%c0, %c0_0, %c0_1] : memref<8x8x19xf32, #tpu.memory_space<vmem>>, vector<8x8x19xf32>
    %1 = vector.shape_cast %0 : vector<8x8x19xf32> to vector<64x19xf32>
    %c0_2 = arith.constant 0 : index
    %c0_3 = arith.constant 0 : index
    %2 = vector.load %arg1[%c0_2, %c0_3] : memref<19x512xf32, #tpu.memory_space<vmem>>, vector<19x512xf32>
    %cst = arith.constant dense<0.000000e+00> : vector<64x512xf32>
    %3 = tpu.matmul %1, %2, %cst {dimension_numbers = #tpu.dot_dimension_numbers<[1], [0], [0], [1], [0, 0, 1, 1], [], []>} : vector<64x19xf32>, vector<19x512xf32>, vector<64x512xf32> -> vector<64x512xf32>
    %c0_4 = arith.constant 0 : index
    %c0_5 = arith.constant 0 : index
    %4 = vector.load %arg2[%c0_4, %c0_5] : memref<1x512xf32, #tpu.memory_space<vmem>>, vector<1x512xf32>
    %5 = vector.broadcast %4 : vector<1x512xf32> to vector<64x512xf32>
    %6 = arith.addf %3, %5 : vector<64x512xf32>
    %7 = vector.shape_cast %6 : vector<64x512xf32> to vector<8x8x512xf32>
    %c0_6 = arith.constant 0 : index
    %c0_7 = arith.constant 0 : index
    %c0_8 = arith.constant 0 : index
    %8 = vector.load %arg7[%c0_6, %c0_7, %c0_8] : memref<8x8x512xf32, #tpu.memory_space<vmem>>, vector<8x8x512xf32>
    tpu.vector_store %arg7[%c0_6, %c0_7, %c0_8], %7 {strides = array<i32>} : memref<8x8x512xf32, #tpu.memory_space<vmem>>, vector<8x8x512xf32>,
    %c0_9 = arith.constant 0 : index
    %c0_10 = arith.constant 0 : index
    %9 = vector.load %arg3[%c0_9, %c0_10] : memref<128x512xbf16, #tpu.memory_space<vmem>>, vector<128x512xbf16>
    %cst_11 = arith.constant 0.000000e+00 : f32
    %10 = vector.broadcast %cst_11 : f32 to vector<8x128xf32>
    %cst_12 = arith.constant 0.000000e+00 : f32
    %11 = vector.broadcast %cst_12 : f32 to vector<8x128xf32>
    %c0_i32 = arith.constant 0 : i32
    %12 = arith.index_cast %c0_i32 : i32 to index
    %c0_13 = arith.constant 0 : index
    %c0_14 = arith.constant 0 : index
    %13 = vector.load %arg7[%12, %c0_13, %c0_14] : memref<8x8x512xf32, #tpu.memory_space<vmem>>, vector<1x8x512xf32>
    %14 = vector.shape_cast %13 : vector<1x8x512xf32> to vector<8x512xf32>
    %15 = arith.truncf %10 : vector<8x128xf32> to vector<8x128xbf16>
    %cst_15 = arith.constant dense<0.000000e+00> : vector<8x512xf32>
    %16 = tpu.matmul %15, %9, %cst_15 {dimension_numbers = #tpu.dot_dimension_numbers<[1], [0], [0], [1], [0, 0, 1, 1], [], []>} : vector<8x128xbf16>, vector<128x512xbf16>, vector<8x512xf32> -> vector<8x512xf32>
    %17 = arith.addf %14, %16 : vector<8x512xf32>
    %18 = vector.extract_strided_slice %17 {offsets = [0, 0], sizes = [8, 384], strides = [1, 1]} : vector<8x512xf32> to vector<8x384xf32>
    %19 = arith.negf %18 : vector<8x384xf32>
    %20 = math.exp %19 : vector<8x384xf32>
    %cst_16 = arith.constant 1.000000e+00 : f32
    %21 = vector.broadcast %cst_16 : f32 to vector<8x384xf32>
    %22 = arith.addf %21, %20 : vector<8x384xf32>
    %23 = arith.divf %21, %22 : vector<8x384xf32>
    %24 = vector.extract_strided_slice %23 {offsets = [0, 0], sizes = [8, 128], strides = [1, 1]} : vector<8x384xf32> to vector<8x128xf32>
    %25 = vector.extract_strided_slice %23 {offsets = [0, 128], sizes = [8, 128], strides = [1, 1]} : vector<8x384xf32> to vector<8x128xf32>
    %26 = vector.extract_strided_slice %23 {offsets = [0, 256], sizes = [8, 128], strides = [1, 1]} : vector<8x384xf32> to vector<8x128xf32>
    %27 = vector.extract_strided_slice %17 {offsets = [0, 384], sizes = [8, 128], strides = [1, 1]} : vector<8x512xf32> to vector<8x128xf32>
    %28 = math.tanh %27 : vector<8x128xf32>
    %29 = arith.mulf %25, %11 : vector<8x128xf32>
    %30 = arith.mulf %24, %28 : vector<8x128xf32>
    %31 = arith.addf %29, %30 : vector<8x128xf32>
    %32 = math.tanh %31 : vector<8x128xf32>
    %33 = arith.mulf %26, %32 : vector<8x128xf32>
    %c1_i32 = arith.constant 1 : i32
    %34 = arith.index_cast %c1_i32 : i32 to index
    %c0_17 = arith.constant 0 : index
    %c0_18 = arith.constant 0 : index
    %35 = vector.load %arg7[%34, %c0_17, %c0_18] : memref<8x8x512xf32, #tpu.memory_space<vmem>>, vector<1x8x512xf32>
    %36 = vector.shape_cast %35 : vector<1x8x512xf32> to vector<8x512xf32>
    %37 = arith.truncf %33 : vector<8x128xf32> to vector<8x128xbf16>
    %cst_19 = arith.constant dense<0.000000e+00> : vector<8x512xf32>
    %38 = tpu.matmul %37, %9, %cst_19 {dimension_numbers = #tpu.dot_dimension_numbers<[1], [0], [0], [1], [0, 0, 1, 1], [], []>} : vector<8x128xbf16>, vector<128x512xbf16>, vector<8x512xf32> -> vector<8x512xf32>
    %39 = arith.addf %36, %38 : vector<8x512xf32>
    %40 = vector.extract_strided_slice %39 {offsets = [0, 0], sizes = [8, 384], strides = [1, 1]} : vector<8x512xf32> to vector<8x384xf32>
    %41 = arith.negf %40 : vector<8x384xf32>
    %42 = math.exp %41 : vector<8x384xf32>
    %cst_20 = arith.constant 1.000000e+00 : f32
    %43 = vector.broadcast %cst_20 : f32 to vector<8x384xf32>
    %44 = arith.addf %43, %42 : vector<8x384xf32>
    %45 = arith.divf %43, %44 : vector<8x384xf32>
    %46 = vector.extract_strided_slice %45 {offsets = [0, 0], sizes = [8, 128], strides = [1, 1]} : vector<8x384xf32> to vector<8x128xf32>
    %47 = vector.extract_strided_slice %45 {offsets = [0, 128], sizes = [8, 128], strides = [1, 1]} : vector<8x384xf32> to vector<8x128xf32>
    %48 = vector.extract_strided_slice %45 {offsets = [0, 256], sizes = [8, 128], strides = [1, 1]} : vector<8x384xf32> to vector<8x128xf32>
    %49 = vector.extract_strided_slice %39 {offsets = [0, 384], sizes = [8, 128], strides = [1, 1]} : vector<8x512xf32> to vector<8x128xf32>
    %50 = math.tanh %49 : vector<8x128xf32>
    %51 = arith.mulf %47, %31 : vector<8x128xf32>
    %52 = arith.mulf %46, %50 : vector<8x128xf32>
    %53 = arith.addf %51, %52 : vector<8x128xf32>
    %54 = math.tanh %53 : vector<8x128xf32>
    %55 = arith.mulf %48, %54 : vector<8x128xf32>
    %c2_i32 = arith.constant 2 : i32
    %56 = arith.index_cast %c2_i32 : i32 to index
    %c0_21 = arith.constant 0 : index
    %c0_22 = arith.constant 0 : index
    %57 = vector.load %arg7[%56, %c0_21, %c0_22] : memref<8x8x512xf32, #tpu.memory_space<vmem>>, vector<1x8x512xf32>
    %58 = vector.shape_cast %57 : vector<1x8x512xf32> to vector<8x512xf32>
    %59 = arith.truncf %55 : vector<8x128xf32> to vector<8x128xbf16>
    %cst_23 = arith.constant dense<0.000000e+00> : vector<8x512xf32>
    %60 = tpu.matmul %59, %9, %cst_23 {dimension_numbers = #tpu.dot_dimension_numbers<[1], [0], [0], [1], [0, 0, 1, 1], [], []>} : vector<8x128xbf16>, vector<128x512xbf16>, vector<8x512xf32> -> vector<8x512xf32>
    %61 = arith.addf %58, %60 : vector<8x512xf32>
    %62 = vector.extract_strided_slice %61 {offsets = [0, 0], sizes = [8, 384], strides = [1, 1]} : vector<8x512xf32> to vector<8x384xf32>
    %63 = arith.negf %62 : vector<8x384xf32>
    %64 = math.exp %63 : vector<8x384xf32>
    %cst_24 = arith.constant 1.000000e+00 : f32
    %65 = vector.broadcast %cst_24 : f32 to vector<8x384xf32>
    %66 = arith.addf %65, %64 : vector<8x384xf32>
    %67 = arith.divf %65, %66 : vector<8x384xf32>
    %68 = vector.extract_strided_slice %67 {offsets = [0, 0], sizes = [8, 128], strides = [1, 1]} : vector<8x384xf32> to vector<8x128xf32>
    %69 = vector.extract_strided_slice %67 {offsets = [0, 128], sizes = [8, 128], strides = [1, 1]} : vector<8x384xf32> to vector<8x128xf32>
    %70 = vector.extract_strided_slice %67 {offsets = [0, 256], sizes = [8, 128], strides = [1, 1]} : vector<8x384xf32> to vector<8x128xf32>
    %71 = vector.extract_strided_slice %61 {offsets = [0, 384], sizes = [8, 128], strides = [1, 1]} : vector<8x512xf32> to vector<8x128xf32>
    %72 = math.tanh %71 : vector<8x128xf32>
    %73 = arith.mulf %69, %53 : vector<8x128xf32>
    %74 = arith.mulf %68, %72 : vector<8x128xf32>
    %75 = arith.addf %73, %74 : vector<8x128xf32>
    %76 = math.tanh %75 : vector<8x128xf32>
    %77 = arith.mulf %70, %76 : vector<8x128xf32>
    %c3_i32 = arith.constant 3 : i32
    %78 = arith.index_cast %c3_i32 : i32 to index
    %c0_25 = arith.constant 0 : index
    %c0_26 = arith.constant 0 : index
    %79 = vector.load %arg7[%78, %c0_25, %c0_26] : memref<8x8x512xf32, #tpu.memory_space<vmem>>, vector<1x8x512xf32>
    %80 = vector.shape_cast %79 : vector<1x8x512xf32> to vector<8x512xf32>
    %81 = arith.truncf %77 : vector<8x128xf32> to vector<8x128xbf16>
    %cst_27 = arith.constant dense<0.000000e+00> : vector<8x512xf32>
    %82 = tpu.matmul %81, %9, %cst_27 {dimension_numbers = #tpu.dot_dimension_numbers<[1], [0], [0], [1], [0, 0, 1, 1], [], []>} : vector<8x128xbf16>, vector<128x512xbf16>, vector<8x512xf32> -> vector<8x512xf32>
    %83 = arith.addf %80, %82 : vector<8x512xf32>
    %84 = vector.extract_strided_slice %83 {offsets = [0, 0], sizes = [8, 384], strides = [1, 1]} : vector<8x512xf32> to vector<8x384xf32>
    %85 = arith.negf %84 : vector<8x384xf32>
    %86 = math.exp %85 : vector<8x384xf32>
    %cst_28 = arith.constant 1.000000e+00 : f32
    %87 = vector.broadcast %cst_28 : f32 to vector<8x384xf32>
    %88 = arith.addf %87, %86 : vector<8x384xf32>
    %89 = arith.divf %87, %88 : vector<8x384xf32>
    %90 = vector.extract_strided_slice %89 {offsets = [0, 0], sizes = [8, 128], strides = [1, 1]} : vector<8x384xf32> to vector<8x128xf32>
    %91 = vector.extract_strided_slice %89 {offsets = [0, 128], sizes = [8, 128], strides = [1, 1]} : vector<8x384xf32> to vector<8x128xf32>
    %92 = vector.extract_strided_slice %89 {offsets = [0, 256], sizes = [8, 128], strides = [1, 1]} : vector<8x384xf32> to vector<8x128xf32>
    %93 = vector.extract_strided_slice %83 {offsets = [0, 384], sizes = [8, 128], strides = [1, 1]} : vector<8x512xf32> to vector<8x128xf32>
    %94 = math.tanh %93 : vector<8x128xf32>
    %95 = arith.mulf %91, %75 : vector<8x128xf32>
    %96 = arith.mulf %90, %94 : vector<8x128xf32>
    %97 = arith.addf %95, %96 : vector<8x128xf32>
    %98 = math.tanh %97 : vector<8x128xf32>
    %99 = arith.mulf %92, %98 : vector<8x128xf32>
    %c4_i32 = arith.constant 4 : i32
    %100 = arith.index_cast %c4_i32 : i32 to index
    %c0_29 = arith.constant 0 : index
    %c0_30 = arith.constant 0 : index
    %101 = vector.load %arg7[%100, %c0_29, %c0_30] : memref<8x8x512xf32, #tpu.memory_space<vmem>>, vector<1x8x512xf32>
    %102 = vector.shape_cast %101 : vector<1x8x512xf32> to vector<8x512xf32>
    %103 = arith.truncf %99 : vector<8x128xf32> to vector<8x128xbf16>
    %cst_31 = arith.constant dense<0.000000e+00> : vector<8x512xf32>
    %104 = tpu.matmul %103, %9, %cst_31 {dimension_numbers = #tpu.dot_dimension_numbers<[1], [0], [0], [1], [0, 0, 1, 1], [], []>} : vector<8x128xbf16>, vector<128x512xbf16>, vector<8x512xf32> -> vector<8x512xf32>
    %105 = arith.addf %102, %104 : vector<8x512xf32>
    %106 = vector.extract_strided_slice %105 {offsets = [0, 0], sizes = [8, 384], strides = [1, 1]} : vector<8x512xf32> to vector<8x384xf32>
    %107 = arith.negf %106 : vector<8x384xf32>
    %108 = math.exp %107 : vector<8x384xf32>
    %cst_32 = arith.constant 1.000000e+00 : f32
    %109 = vector.broadcast %cst_32 : f32 to vector<8x384xf32>
    %110 = arith.addf %109, %108 : vector<8x384xf32>
    %111 = arith.divf %109, %110 : vector<8x384xf32>
    %112 = vector.extract_strided_slice %111 {offsets = [0, 0], sizes = [8, 128], strides = [1, 1]} : vector<8x384xf32> to vector<8x128xf32>
    %113 = vector.extract_strided_slice %111 {offsets = [0, 128], sizes = [8, 128], strides = [1, 1]} : vector<8x384xf32> to vector<8x128xf32>
    %114 = vector.extract_strided_slice %111 {offsets = [0, 256], sizes = [8, 128], strides = [1, 1]} : vector<8x384xf32> to vector<8x128xf32>
    %115 = vector.extract_strided_slice %105 {offsets = [0, 384], sizes = [8, 128], strides = [1, 1]} : vector<8x512xf32> to vector<8x128xf32>
    %116 = math.tanh %115 : vector<8x128xf32>
    %117 = arith.mulf %113, %97 : vector<8x128xf32>
    %118 = arith.mulf %112, %116 : vector<8x128xf32>
    %119 = arith.addf %117, %118 : vector<8x128xf32>
    %120 = math.tanh %119 : vector<8x128xf32>
    %121 = arith.mulf %114, %120 : vector<8x128xf32>
    %c5_i32 = arith.constant 5 : i32
    %122 = arith.index_cast %c5_i32 : i32 to index
    %c0_33 = arith.constant 0 : index
    %c0_34 = arith.constant 0 : index
    %123 = vector.load %arg7[%122, %c0_33, %c0_34] : memref<8x8x512xf32, #tpu.memory_space<vmem>>, vector<1x8x512xf32>
    %124 = vector.shape_cast %123 : vector<1x8x512xf32> to vector<8x512xf32>
    %125 = arith.truncf %121 : vector<8x128xf32> to vector<8x128xbf16>
    %cst_35 = arith.constant dense<0.000000e+00> : vector<8x512xf32>
    %126 = tpu.matmul %125, %9, %cst_35 {dimension_numbers = #tpu.dot_dimension_numbers<[1], [0], [0], [1], [0, 0, 1, 1], [], []>} : vector<8x128xbf16>, vector<128x512xbf16>, vector<8x512xf32> -> vector<8x512xf32>
    %127 = arith.addf %124, %126 : vector<8x512xf32>
    %128 = vector.extract_strided_slice %127 {offsets = [0, 0], sizes = [8, 384], strides = [1, 1]} : vector<8x512xf32> to vector<8x384xf32>
    %129 = arith.negf %128 : vector<8x384xf32>
    %130 = math.exp %129 : vector<8x384xf32>
    %cst_36 = arith.constant 1.000000e+00 : f32
    %131 = vector.broadcast %cst_36 : f32 to vector<8x384xf32>
    %132 = arith.addf %131, %130 : vector<8x384xf32>
    %133 = arith.divf %131, %132 : vector<8x384xf32>
    %134 = vector.extract_strided_slice %133 {offsets = [0, 0], sizes = [8, 128], strides = [1, 1]} : vector<8x384xf32> to vector<8x128xf32>
    %135 = vector.extract_strided_slice %133 {offsets = [0, 128], sizes = [8, 128], strides = [1, 1]} : vector<8x384xf32> to vector<8x128xf32>
    %136 = vector.extract_strided_slice %133 {offsets = [0, 256], sizes = [8, 128], strides = [1, 1]} : vector<8x384xf32> to vector<8x128xf32>
    %137 = vector.extract_strided_slice %127 {offsets = [0, 384], sizes = [8, 128], strides = [1, 1]} : vector<8x512xf32> to vector<8x128xf32>
    %138 = math.tanh %137 : vector<8x128xf32>
    %139 = arith.mulf %135, %119 : vector<8x128xf32>
    %140 = arith.mulf %134, %138 : vector<8x128xf32>
    %141 = arith.addf %139, %140 : vector<8x128xf32>
    %142 = math.tanh %141 : vector<8x128xf32>
    %143 = arith.mulf %136, %142 : vector<8x128xf32>
    %c6_i32 = arith.constant 6 : i32
    %144 = arith.index_cast %c6_i32 : i32 to index
    %c0_37 = arith.constant 0 : index
    %c0_38 = arith.constant 0 : index
    %145 = vector.load %arg7[%144, %c0_37, %c0_38] : memref<8x8x512xf32, #tpu.memory_space<vmem>>, vector<1x8x512xf32>
    %146 = vector.shape_cast %145 : vector<1x8x512xf32> to vector<8x512xf32>
    %147 = arith.truncf %143 : vector<8x128xf32> to vector<8x128xbf16>
    %cst_39 = arith.constant dense<0.000000e+00> : vector<8x512xf32>
    %148 = tpu.matmul %147, %9, %cst_39 {dimension_numbers = #tpu.dot_dimension_numbers<[1], [0], [0], [1], [0, 0, 1, 1], [], []>} : vector<8x128xbf16>, vector<128x512xbf16>, vector<8x512xf32> -> vector<8x512xf32>
    %149 = arith.addf %146, %148 : vector<8x512xf32>
    %150 = vector.extract_strided_slice %149 {offsets = [0, 0], sizes = [8, 384], strides = [1, 1]} : vector<8x512xf32> to vector<8x384xf32>
    %151 = arith.negf %150 : vector<8x384xf32>
    %152 = math.exp %151 : vector<8x384xf32>
    %cst_40 = arith.constant 1.000000e+00 : f32
    %153 = vector.broadcast %cst_40 : f32 to vector<8x384xf32>
    %154 = arith.addf %153, %152 : vector<8x384xf32>
    %155 = arith.divf %153, %154 : vector<8x384xf32>
    %156 = vector.extract_strided_slice %155 {offsets = [0, 0], sizes = [8, 128], strides = [1, 1]} : vector<8x384xf32> to vector<8x128xf32>
    %157 = vector.extract_strided_slice %155 {offsets = [0, 128], sizes = [8, 128], strides = [1, 1]} : vector<8x384xf32> to vector<8x128xf32>
    %158 = vector.extract_strided_slice %155 {offsets = [0, 256], sizes = [8, 128], strides = [1, 1]} : vector<8x384xf32> to vector<8x128xf32>
    %159 = vector.extract_strided_slice %149 {offsets = [0, 384], sizes = [8, 128], strides = [1, 1]} : vector<8x512xf32> to vector<8x128xf32>
    %160 = math.tanh %159 : vector<8x128xf32>
    %161 = arith.mulf %157, %141 : vector<8x128xf32>
    %162 = arith.mulf %156, %160 : vector<8x128xf32>
    %163 = arith.addf %161, %162 : vector<8x128xf32>
    %164 = math.tanh %163 : vector<8x128xf32>
    %165 = arith.mulf %158, %164 : vector<8x128xf32>
    %c7_i32 = arith.constant 7 : i32
    %166 = arith.index_cast %c7_i32 : i32 to index
    %c0_41 = arith.constant 0 : index
    %c0_42 = arith.constant 0 : index
    %167 = vector.load %arg7[%166, %c0_41, %c0_42] : memref<8x8x512xf32, #tpu.memory_space<vmem>>, vector<1x8x512xf32>
    %168 = vector.shape_cast %167 : vector<1x8x512xf32> to vector<8x512xf32>
    %169 = arith.truncf %165 : vector<8x128xf32> to vector<8x128xbf16>
    %cst_43 = arith.constant dense<0.000000e+00> : vector<8x512xf32>
    %170 = tpu.matmul %169, %9, %cst_43 {dimension_numbers = #tpu.dot_dimension_numbers<[1], [0], [0], [1], [0, 0, 1, 1], [], []>} : vector<8x128xbf16>, vector<128x512xbf16>, vector<8x512xf32> -> vector<8x512xf32>
    %171 = arith.addf %168, %170 : vector<8x512xf32>
    %172 = vector.extract_strided_slice %171 {offsets = [0, 0], sizes = [8, 384], strides = [1, 1]} : vector<8x512xf32> to vector<8x384xf32>
    %173 = arith.negf %172 : vector<8x384xf32>
    %174 = math.exp %173 : vector<8x384xf32>
    %cst_44 = arith.constant 1.000000e+00 : f32
    %175 = vector.broadcast %cst_44 : f32 to vector<8x384xf32>
    %176 = arith.addf %175, %174 : vector<8x384xf32>
    %177 = arith.divf %175, %176 : vector<8x384xf32>
    %178 = vector.extract_strided_slice %177 {offsets = [0, 0], sizes = [8, 128], strides = [1, 1]} : vector<8x384xf32> to vector<8x128xf32>
    %179 = vector.extract_strided_slice %177 {offsets = [0, 128], sizes = [8, 128], strides = [1, 1]} : vector<8x384xf32> to vector<8x128xf32>
    %180 = vector.extract_strided_slice %177 {offsets = [0, 256], sizes = [8, 128], strides = [1, 1]} : vector<8x384xf32> to vector<8x128xf32>
    %181 = vector.extract_strided_slice %171 {offsets = [0, 384], sizes = [8, 128], strides = [1, 1]} : vector<8x512xf32> to vector<8x128xf32>
    %182 = math.tanh %181 : vector<8x128xf32>
    %183 = arith.mulf %179, %163 : vector<8x128xf32>
    %184 = arith.mulf %178, %182 : vector<8x128xf32>
    %185 = arith.addf %183, %184 : vector<8x128xf32>
    %186 = math.tanh %185 : vector<8x128xf32>
    %187 = arith.mulf %180, %186 : vector<8x128xf32>
    %c8_i32 = arith.constant 8 : i32
    %c0_45 = arith.constant 0 : index
    %c0_46 = arith.constant 0 : index
    %188 = vector.load %arg4[%c0_45, %c0_46] : memref<128x20xf32, #tpu.memory_space<vmem>>, vector<128x20xf32>
    %cst_47 = arith.constant dense<0.000000e+00> : vector<8x20xf32>
    %189 = tpu.matmul %187, %188, %cst_47 {dimension_numbers = #tpu.dot_dimension_numbers<[1], [0], [0], [1], [0, 0, 1, 1], [], []>} : vector<8x128xf32>, vector<128x20xf32>, vector<8x20xf32> -> vector<8x20xf32>
    %c0_48 = arith.constant 0 : index
    %c0_49 = arith.constant 0 : index
    %190 = vector.load %arg5[%c0_48, %c0_49] : memref<1x20xf32, #tpu.memory_space<vmem>>, vector<1x20xf32>
    %191 = vector.broadcast %190 : vector<1x20xf32> to vector<8x20xf32>
    %192 = arith.addf %189, %191 : vector<8x20xf32>
    %cst_50 = arith.constant dense<0xFF800000> : vector<8xf32>
    %193 = vector.multi_reduction <maximumf>, %192, %cst_50 [1] : vector<8x20xf32> to vector<8xf32>
    %194 = vector.shape_cast %193 : vector<8xf32> to vector<8x1xf32>
    %195 = vector.broadcast %194 : vector<8x1xf32> to vector<8x20xf32>
    %196 = arith.subf %192, %195 : vector<8x20xf32>
    %197 = math.exp %196 : vector<8x20xf32>
    %cst_51 = arith.constant dense<0.000000e+00> : vector<8xf32>
    %198 = vector.multi_reduction <add>, %197, %cst_51 [1] : vector<8x20xf32> to vector<8xf32>
    %199 = vector.shape_cast %198 : vector<8xf32> to vector<8x1xf32>
    %200 = math.log %199 : vector<8x1xf32>
    %201 = arith.addf %194, %200 : vector<8x1xf32>
    %202 = vector.broadcast %201 : vector<8x1xf32> to vector<8x20xf32>
    %203 = arith.subf %192, %202 : vector<8x20xf32>
    %c0_52 = arith.constant 0 : index
    %c0_53 = arith.constant 0 : index
    %204 = vector.load %arg6[%c0_52, %c0_53] : memref<8x20xf32, #tpu.memory_space<vmem>>, vector<8x20xf32>
    tpu.vector_store %arg6[%c0_52, %c0_53], %203 {strides = array<i32>} : memref<8x20xf32, #tpu.memory_space<vmem>>, vector<8x20xf32>,
    return
  }
}

</mosaic_0001>

<bundles_post_ra>
// kernel: tpu_custom_call.1
= control target key start
LH: loop header
LB: loop body
LE: loop exit
PB: predicated region body
PF: predicated region fallthrough
CT: control target
= control target key end

     0   :  { %11 = vsyncpa [#allocation4], 0  ;;  %s2768_s0 = inlined_call_operand.hbm [shape: f32[8,8,19], index: 0, kind: input, shape index: {}]   ;;  %s2769_s1 = inlined_call_operand.vmem [shape: f32[19,512], index: 1, kind: input, shape index: {}]   ;;  %s2770_s2 = inlined_call_operand.vmem [shape: f32[1,512], index: 2, kind: input, shape index: {}]   ;;  %s2771_s3 = inlined_call_operand.hbm [shape: bf16[128,512], index: 3, kind: input, shape index: {}]   ;;  %s2772_s4 = inlined_call_operand.vmem [shape: f32[128,20], index: 4, kind: input, shape index: {}]   ;;  %s2773_s5 = inlined_call_operand.vmem [shape: f32[1,20], index: 5, kind: input, shape index: {}]   ;;  %s2774_s6 = inlined_call_operand.hbm [shape: f32[8,20], index: 6, kind: output, shape index: {}]  }
   0x1   :  { %12 = vsyncpa [#allocation7], 0 }
   0x2   :  { %13 = vsyncpa [#allocation5], 0  ;;  %s2050_s21 = smov [#allocation3]  }
   0x3   :  { %s19_s22 = sshll.u32 %s2050_s21, 4  ;;  %s20_s22 = int_to_ptr.vmem [resolvable:$true] %s19_s22 }
   0x4   :  { %s1992_s23 = scalar_lea.vmem %s20_s22, 1024  ;;  %p1997_p1 = scmp.lt.s32.totalorder %s20_s22, %s20_s22 }
   0x5   :  { %p1993_p0 = scmp.ne.s32.totalorder %s20_s22, %s1992_s23  ;;  %p1998_p2 = scmp.lt.s32.totalorder %s1992_s23, %s1992_s23 }
   0x7   :  { %p1999_p3 = por %p1998_p2, %p1997_p1 }
   0x9   :  { %p2000_p4 = pnand %p1999_p3, %p1993_p0 }
   0xb   :  { %2003 = shalt.err (!%p2000_p4)
}
   0xc   :  { %s2051_s24 = smov 128   ;;  %s2052_s25 = smov 8  }
   0xd   :  { %25 = dma.hbm_to_vmem [thread:$0]  %s2768_s0, 1024, %s20_s22, [#allocation4], %s2051_s24, %s2051_s24, %s2052_s25  }
   0xe   :  { %s2053_s28 = smov [#allocation6]  }
   0xf   :  { %s35_s29 = sshll.u32 %s2053_s28, 4  ;;  %s36_s29 = int_to_ptr.vmem [resolvable:$true] %s35_s29 }
  0x10   :  { %s2012_s30 = scalar_lea.vmem %s36_s29, 4096  ;;  %p2017_p6 = scmp.lt.s32.totalorder %s36_s29, %s36_s29 }
  0x11   :  { %p2013_p5 = scmp.ne.s32.totalorder %s36_s29, %s2012_s30  ;;  %p2018_p7 = scmp.lt.s32.totalorder %s2012_s30, %s2012_s30 }
  0x13   :  { %p2019_p8 = por %p2018_p7, %p2017_p6 }
  0x15   :  { %p2020_p9 = pnand %p2019_p8, %p2013_p5 }
  0x17   :  { %2023 = shalt.err (!%p2020_p9)
}
  0x18   :  { %s2054_s7 = smov 256   ;;  %s2055_s8 = smov 16  }
  0x19   :  { %41 = dma.hbm_to_vmem [thread:$0]  %s2771_s3, 4096, %s36_s29, [#allocation7], %s2054_s7, %s2054_s7, %s2055_s8  }
  0x1a   :  { %2044 = dma.done.wait [#allocation4], 1024  }
  0x1b   :  { %2045 = vsyncadd [#allocation4], 4294966272 }
  0x1c   :  { %2046 = dma.done.wait [#allocation7], 4096  }
  0x1d   :  { %2047 = vsyncadd [#allocation7], 4294963200  ;;  %v2775_v0 = vmov 0.0   ;;  %vm120_vm0 = vcmask 1042432   ;;  %v70_v1 = vld [vmem:[%s2769_s1 + $0x48] sm:$0x7]  ;;  %v75_v54 = vlaneseq }
  0x1e   :  { %197 = vmatprep.mubr.f32.mxu0 %v2775_v0  ;;  %310 = vmatprep.mubr.f32.mxu1 %v2775_v0  ;;  %v72_v2 = vld [vmem:[%s2769_s1 + $0x58] sm:$0x7]  ;;  %v69_v3 = vld [vmem:[%s2769_s1 + $0x40] sm:$0x7]  ;;  %v71_v4 = vld [vmem:[%s2769_s1 + $0x50] sm:$0x7] }
  0x1f   :  { %1633 = vmatprep.subr.msk.mxu0 %vm120_vm0, %v70_v1  ;;  %1643 = vmatprep.subr.msk.mxu1 %vm120_vm0, %v72_v2  ;;  %v66_v5 = vld [vmem:[%s2769_s1 + $0x28] sm:$0xff]  ;;  %v68_v6 = vld [vmem:[%s2769_s1 + $0x38] sm:$0xff]  ;;  %v65_v7 = vld [vmem:[%s2769_s1 + $0x20] sm:$0xff]  ;;  %vm95_vm1 = vcmask 154624   ;;  %v2777_v53 = vmov 0   ;;  %v76_v55 = vshrl.u32 %v75_v54, 7 }
  0x20   :  { %1634 = vmatpush1.msk.msra.mxu0 %vm120_vm0, %v69_v3  ;;  %1644 = vmatpush1.msk.msra.mxu1 %vm120_vm0, %v71_v4  ;;  %v67_v8 = vld [vmem:[%s2769_s1 + $0x30] sm:$0xff]  ;;  %v62_v9 = vld [vmem:[%s2769_s1 + $0x8] sm:$0xff]  ;;  %v64_v10 = vld [vmem:[%s2769_s1 + $0x18] sm:$0xff]  ;;  %vm2058_vm2 = vmmov 0   ;;  %vm1602_vm3 = vcmask 162816  }
  0x21   :  { %161 = vmatprep.subr.mxu0 %v66_v5  ;;  %274 = vmatprep.subr.mxu1 %v68_v6  ;;  %v61_v11 = vld [vmem:[%s2769_s1] sm:$0xff]  ;;  %v63_v12 = vld [vmem:[%s2769_s1 + $0x10] sm:$0xff]  ;;  %v2141_v15 = vld [vmem:[#allocation6 + $0xec] ss:$16 sps:$4 sm:$0xff]   ;;  %v77_v56 = vsub.s32 0, %v76_v55  ;;  %v85_v57 = vsub.s32 2, %v76_v55 }
  0x22   :  { %162 = vmatpush1.msra.mxu0 %v65_v7  ;;  %275 = vmatpush1.msra.mxu1 %v67_v8  ;;  %v53_v13 = vld [vmem:[#allocation3] sm:$0xff]  ;;  %v2145_v17 = vld [vmem:[#allocation6 + $0xe8] ss:$16 sps:$4 sm:$0xff]   ;;  %v2155_v20 = vld [vmem:[#allocation6 + $0xcc] ss:$16 sps:$4 sm:$0xff]   ;;  %v81_v61 = vsub.s32 1, %v76_v55 }
  0x23   :  { %163 = vmatprep.subr.mxu0 %v62_v9  ;;  %276 = vmatprep.subr.mxu1 %v64_v10  ;;  %v2139_v14 = vld [vmem:[#allocation6 + $0xe4] ss:$16 sps:$4 sm:$0xff]   ;;  %v2143_v16 = vld [vmem:[#allocation6 + $0xe0] ss:$16 sps:$4 sm:$0xff]   ;;  %v54_v18 = vld [vmem:[#allocation3 + $0x8] sm:$0xff]  ;;  %v89_v62 = vsub.s32 3, %v76_v55 }
  0x24   :  { %164 = vmatpush1.msra.mxu0 %v61_v11  ;;  %277 = vmatpush1.msra.mxu1 %v63_v12  ;;  %v2151_v19 = vld [vmem:[#allocation6 + $0xc4] ss:$16 sps:$4 sm:$0xff]   ;;  %v2157_v21 = vld [vmem:[#allocation6 + $0xc0] ss:$16 sps:$4 sm:$0xff]   ;;  %v2159_v22 = vld [vmem:[#allocation6 + $0xc8] ss:$16 sps:$4 sm:$0xff]  }
  0x25   :  { %1635 = vmatmul.mubr.msk.f32.vlgmr.msra.gmra.mxu0 %vm95_vm1, %v53_v13  ;;  %1645 = vmatmul.mubr.msk.f32.vlgmr.msra.gmra.mxu1 %vm95_vm1, %v53_v13  ;;  %v55_v23 = vld [vmem:[#allocation3 + $0x10] sm:$0xff]  ;;  %v2169_v25 = vld [vmem:[#allocation6 + $0xac] ss:$16 sps:$4 sm:$0xff]   ;;  %v2175_v27 = vld [vmem:[#allocation6 + $0xa8] ss:$16 sps:$4 sm:$0xff]  }
  0x26   :  { %587 = vmatprep.subr.bf16.mxu0 %v2139_v14  ;;  %628 = vmatprep.subr.bf16.mxu1 %v2141_v15  ;;  %v2167_v24 = vld [vmem:[#allocation6 + $0xa4] ss:$16 sps:$4 sm:$0xff]   ;;  %v2171_v26 = vld [vmem:[#allocation6 + $0xa0] ss:$16 sps:$4 sm:$0xff]   ;;  %v56_v28 = vld [vmem:[#allocation3 + $0x18] sm:$0xff] }
  0x27   :  { %588 = vmatpush1.bf16.msra.mxu0 %v2143_v16  ;;  %629 = vmatpush1.bf16.msra.mxu1 %v2145_v17  ;;  %v2181_v29 = vld [vmem:[#allocation6 + $0x84] ss:$16 sps:$4 sm:$0xff]   ;;  %v2183_v30 = vld [vmem:[#allocation6 + $0x8c] ss:$16 sps:$4 sm:$0xff]   ;;  %v2187_v31 = vld [vmem:[#allocation6 + $0x80] ss:$16 sps:$4 sm:$0xff]  }
  0x28   :  { %203 = vmatprep.mubr.f32.mxu0 %v2775_v0  ;;  %316 = vmatprep.mubr.f32.mxu1 %v2775_v0  ;;  %v2191_v32 = vld [vmem:[#allocation6 + $0x88] ss:$16 sps:$4 sm:$0xff]   ;;  %v57_v33 = vld [vmem:[#allocation3 + $0x20] sm:$0xff]  ;;  %v2201_v35 = vld [vmem:[#allocation6 + $0x6c] ss:$16 sps:$4 sm:$0xff]  }
  0x29   :  { %1636 = vmatmul.mubr.msk.f32.gmra.mxu0 %vm95_vm1, %v54_v18  ;;  %1646 = vmatmul.mubr.msk.f32.gmra.mxu1 %vm95_vm1, %v54_v18  ;;  %v2197_v34 = vld [vmem:[#allocation6 + $0x64] ss:$16 sps:$4 sm:$0xff]   ;;  %v2205_v36 = vld [vmem:[#allocation6 + $0x60] ss:$16 sps:$4 sm:$0xff]   ;;  %v2207_v37 = vld [vmem:[#allocation6 + $0x68] ss:$16 sps:$4 sm:$0xff]  }
  0x2a   :  { %589 = vmatprep.subr.bf16.mxu0 %v2151_v19  ;;  %630 = vmatprep.subr.bf16.mxu1 %v2155_v20  ;;  %v58_v38 = vld [vmem:[#allocation3 + $0x28] sm:$0xff]  ;;  %v2215_v39 = vld [vmem:[#allocation6 + $0x44] ss:$16 sps:$4 sm:$0xff]   ;;  %v2219_v41 = vld [vmem:[#allocation6 + $0x40] ss:$16 sps:$4 sm:$0xff]  }
  0x2b   :  { %590 = vmatpush1.bf16.msra.mxu0 %v2157_v21  ;;  %631 = vmatpush1.bf16.msra.mxu1 %v2159_v22  ;;  %v2217_v40 = vld [vmem:[#allocation6 + $0x4c] ss:$16 sps:$4 sm:$0xff]   ;;  %v2223_v42 = vld [vmem:[#allocation6 + $0x48] ss:$16 sps:$4 sm:$0xff]   ;;  %v59_v43 = vld [vmem:[#allocation3 + $0x30] sm:$0xff] }
  0x2c   :  { %209 = vmatprep.mubr.f32.mxu0 %v2775_v0  ;;  %322 = vmatprep.mubr.f32.mxu1 %v2775_v0  ;;  %v2231_v44 = vld [vmem:[#allocation6 + $0x24] ss:$16 sps:$4 sm:$0xff]   ;;  %v2233_v45 = vld [vmem:[#allocation6 + $0x2c] ss:$16 sps:$4 sm:$0xff]   ;;  %v2237_v46 = vld [vmem:[#allocation6 + $0x20] ss:$16 sps:$4 sm:$0xff]  }
  0x2d   :  { %1637 = vmatmul.mubr.msk.f32.gmra.mxu0 %vm95_vm1, %v55_v23  ;;  %1647 = vmatmul.mubr.msk.f32.gmra.mxu1 %vm95_vm1, %v55_v23  ;;  %v2239_v47 = vld [vmem:[#allocation6 + $0x28] ss:$16 sps:$4 sm:$0xff]   ;;  %v2247_v49 = vld [vmem:[#allocation6 + $0x4] ss:$16 sps:$4 sm:$0xff]   ;;  %v2249_v50 = vld [vmem:[#allocation6 + $0xc] ss:$16 sps:$4 sm:$0xff]  }
  0x2e   :  { %591 = vmatprep.subr.bf16.mxu0 %v2167_v24  ;;  %632 = vmatprep.subr.bf16.mxu1 %v2169_v25  ;;  %v60_v48 = vld [vmem:[#allocation3 + $0x38] sm:$0xff]  ;;  %v2253_v51 = vld [vmem:[#allocation6] ss:$16 sps:$4 sm:$0xff]  }
  0x2f   :  { %592 = vmatpush1.bf16.msra.mxu0 %v2171_v26  ;;  %633 = vmatpush1.bf16.msra.mxu1 %v2175_v27  ;;  %v2255_v52 = vld [vmem:[#allocation6 + $0x8] ss:$16 sps:$4 sm:$0xff]   ;;  %v73_v58 = vld [vmem:[%s2770_s2] sm:$0xf] }
  0x30   :  { %215 = vmatprep.mubr.f32.mxu0 %v2775_v0  ;;  %328 = vmatprep.mubr.f32.mxu1 %v2775_v0  ;;  %v78_v2 = vrot.slane %v73_v58, %v77_v56  ;;  %v2316_v3 = vrot.slane %v73_v58, %v85_v57  ;;  %v82_v6 = vrot.slane %v73_v58, %v81_v61 }
  0x31   :  { %1638 = vmatmul.mubr.msk.f32.gmra.mxu0 %vm95_vm1, %v56_v28  ;;  %1648 = vmatmul.mubr.msk.f32.gmra.mxu1 %vm95_vm1, %v56_v28  ;;  %v2318_v7 = vrot.slane %v73_v58, %v89_v62 }
  0x32   :  { %593 = vmatprep.subr.bf16.mxu0 %v2181_v29  ;;  %634 = vmatprep.subr.bf16.mxu1 %v2183_v30 }
  0x33   :  { %594 = vmatpush1.bf16.msra.mxu0 %v2187_v31  ;;  %635 = vmatpush1.bf16.msra.mxu1 %v2191_v32 }
  0x34   :  { %221 = vmatprep.mubr.f32.mxu0 %v2775_v0  ;;  %334 = vmatprep.mubr.f32.mxu1 %v2775_v0 }
  0x35   :  { %1639 = vmatmul.mubr.msk.f32.gmra.mxu0 %vm95_vm1, %v57_v33  ;;  %1649 = vmatmul.mubr.msk.f32.gmra.mxu1 %vm95_vm1, %v57_v33 }
  0x36   :  { %595 = vmatprep.subr.bf16.mxu0 %v2197_v34  ;;  %636 = vmatprep.subr.bf16.mxu1 %v2201_v35 }
  0x37   :  { %596 = vmatpush1.bf16.msra.mxu0 %v2205_v36  ;;  %637 = vmatpush1.bf16.msra.mxu1 %v2207_v37 }
  0x38   :  { %227 = vmatprep.mubr.f32.mxu0 %v2775_v0  ;;  %340 = vmatprep.mubr.f32.mxu1 %v2775_v0 }
  0x39   :  { %1640 = vmatmul.mubr.msk.f32.gmra.mxu0 %vm95_vm1, %v58_v38  ;;  %1650 = vmatmul.mubr.msk.f32.gmra.mxu1 %vm95_vm1, %v58_v38 }
  0x3a   :  { %597 = vmatprep.subr.bf16.mxu0 %v2215_v39  ;;  %638 = vmatprep.subr.bf16.mxu1 %v2217_v40 }
  0x3b   :  { %598 = vmatpush1.bf16.msra.mxu0 %v2219_v41  ;;  %639 = vmatpush1.bf16.msra.mxu1 %v2223_v42 }
  0x3c   :  { %233 = vmatprep.mubr.f32.mxu0 %v2775_v0  ;;  %346 = vmatprep.mubr.f32.mxu1 %v2775_v0 }
  0x3d   :  { %1641 = vmatmul.mubr.msk.f32.gmra.mxu0 %vm95_vm1, %v59_v43  ;;  %1651 = vmatmul.mubr.msk.f32.gmra.mxu1 %vm95_vm1, %v59_v43 }
  0x3e   :  { %599 = vmatprep.subr.bf16.mxu0 %v2231_v44  ;;  %640 = vmatprep.subr.bf16.mxu1 %v2233_v45 }
  0x3f   :  { %600 = vmatpush1.bf16.msra.mxu0 %v2237_v46  ;;  %641 = vmatpush1.bf16.msra.mxu1 %v2239_v47 }
  0x40   :  { %239 = vmatprep.mubr.f32.mxu0 %v2775_v0  ;;  %352 = vmatprep.mubr.f32.mxu1 %v2775_v0 }
  0x41   :  { %1642 = vmatmul.mubr.msk.f32.gmra.mxu0 %vm95_vm1, %v60_v48  ;;  %1652 = vmatmul.mubr.msk.f32.gmra.mxu1 %vm95_vm1, %v60_v48 }
  0x42   :  { %601 = vmatprep.subr.bf16.mxu0 %v2247_v49  ;;  %642 = vmatprep.subr.bf16.mxu1 %v2249_v50 }
  0x43   :  { %602 = vmatpush1.bf16.msra.mxu0 %v2253_v51  ;;  %643 = vmatpush1.bf16.msra.mxu1 %v2255_v52 }
  0x44   :  { %619 = vmatprep.mubr.bf16.mxu0 %v2777_v53  ;;  %660 = vmatprep.mubr.bf16.mxu1 %v2777_v53 }
  0x45   :  { %703 = vmatprep.subr.bf16.mxu0 %v2139_v14  ;;  %744 = vmatprep.subr.bf16.mxu1 %v2141_v15 }
  0x46   :  { %620 = vmatmul.mubr.bf16.vlgmr.msra.gmra.mxu0 %v2777_v53  ;;  %661 = vmatmul.mubr.bf16.vlgmr.msra.gmra.mxu1 %v2777_v53 }
  0x47   :  { %704 = vmatpush1.bf16.msra.mxu0 %v2143_v16  ;;  %745 = vmatpush1.bf16.msra.mxu1 %v2145_v17 }
  0x48   :  { %705 = vmatprep.subr.bf16.mxu0 %v2151_v19  ;;  %746 = vmatprep.subr.bf16.mxu1 %v2155_v20 }
  0x49   :  { %735 = vmatprep.mubr.bf16.mxu0 %v2777_v53  ;;  %776 = vmatprep.mubr.bf16.mxu1 %v2777_v53 }
  0x4b   :  { %706 = vmatpush1.bf16.msra.mxu0 %v2157_v21  ;;  %747 = vmatpush1.bf16.msra.mxu1 %v2159_v22 }
  0x4c   :  { %707 = vmatprep.subr.bf16.mxu0 %v2167_v24  ;;  %748 = vmatprep.subr.bf16.mxu1 %v2169_v25 }
  0x4f   :  { %708 = vmatpush1.bf16.msra.mxu0 %v2171_v26  ;;  %749 = vmatpush1.bf16.msra.mxu1 %v2175_v27 }
  0x50   :  { %709 = vmatprep.subr.bf16.mxu0 %v2181_v29  ;;  %750 = vmatprep.subr.bf16.mxu1 %v2183_v30 }
  0x53   :  { %710 = vmatpush1.bf16.msra.mxu0 %v2187_v31  ;;  %751 = vmatpush1.bf16.msra.mxu1 %v2191_v32 }
  0x54   :  { %711 = vmatprep.subr.bf16.mxu0 %v2197_v34  ;;  %752 = vmatprep.subr.bf16.mxu1 %v2201_v35 }
  0x57   :  { %712 = vmatpush1.bf16.msra.mxu0 %v2205_v36  ;;  %753 = vmatpush1.bf16.msra.mxu1 %v2207_v37 }
  0x58   :  { %713 = vmatprep.subr.bf16.mxu0 %v2215_v39  ;;  %754 = vmatprep.subr.bf16.mxu1 %v2217_v40 }
  0x5b   :  { %714 = vmatpush1.bf16.msra.mxu0 %v2219_v41  ;;  %755 = vmatpush1.bf16.msra.mxu1 %v2223_v42 }
  0x5c   :  { %715 = vmatprep.subr.bf16.mxu0 %v2231_v44  ;;  %756 = vmatprep.subr.bf16.mxu1 %v2233_v45 }
  0x5f   :  { %716 = vmatpush1.bf16.msra.mxu0 %v2237_v46  ;;  %757 = vmatpush1.bf16.msra.mxu1 %v2239_v47 }
  0x60   :  { %717 = vmatprep.subr.bf16.mxu0 %v2247_v49  ;;  %758 = vmatprep.subr.bf16.mxu1 %v2249_v50 }
  0x63   :  { %718 = vmatpush1.bf16.msra.mxu0 %v2253_v51  ;;  %759 = vmatpush1.bf16.msra.mxu1 %v2255_v52 }
  0x64   :  { %819 = vmatprep.subr.bf16.mxu0 %v2139_v14  ;;  %860 = vmatprep.subr.bf16.mxu1 %v2141_v15 }
  0xe5   :  { %v2308_v59 = vpop.f32.mrf.mxu0  ;;  %v2310_v60 = vpop.f32.mrf.mxu1 }
  0xe7   :  { %v2312_v63 = vpop.f32.mrf.mxu0  ;;  %v2314_v1 = vpop.f32.mrf.mxu1 }
  0xe9   :  { %v205_v4 = vpop.f32.mrf.mxu0  ;;  %v318_v5 = vpop.f32.mrf.mxu1 }
  0xea   :  { %v2320_v8 = vadd.f32 %v205_v4, %v78_v2  ;;  %v2323_v9 = vadd.f32 %v318_v5, %v2316_v3 }
  0xeb   :  { %v207_v10 = vpop.f32.mrf.mxu0  ;;  %v320_v11 = vpop.f32.mrf.mxu1 }
  0xec   :  { %v2325_v12 = vadd.f32 %v207_v10, %v82_v6  ;;  %v2328_v13 = vadd.f32 %v320_v11, %v2318_v7 }
  0xed   :  { %v211_v18 = vpop.f32.mrf.mxu0  ;;  %v324_v23 = vpop.f32.mrf.mxu1 }
  0xee   :  { %v2330_v28 = vadd.f32 %v211_v18, %v78_v2  ;;  %v2333_v33 = vadd.f32 %v324_v23, %v2316_v3 }
  0xef   :  { %v213_v38 = vpop.f32.mrf.mxu0  ;;  %v326_v43 = vpop.f32.mrf.mxu1 }
  0xf0   :  { %v2335_v48 = vadd.f32 %v213_v38, %v82_v6  ;;  %v2338_v54 = vadd.f32 %v326_v43, %v2318_v7 }
  0xf1   :  { %v217_v55 = vpop.f32.mrf.mxu0  ;;  %v330_v56 = vpop.f32.mrf.mxu1 }
  0xf2   :  { %v2340_v57 = vadd.f32 %v217_v55, %v78_v2  ;;  %v2343_v58 = vadd.f32 %v330_v56, %v2316_v3 }
  0xf3   :  { %v219_v61 = vpop.f32.mrf.mxu0  ;;  %v332_v62 = vpop.f32.mrf.mxu1 }
  0xf4   :  { %2779 = vst [vmem:[#allocation12_spill] sm:$0xff] %v2340_v57  ;;  %2780 = vst [vmem:[#allocation13_spill] sm:$0xff] %v2343_v58  ;;  %v2345_v4 = vadd.f32 %v219_v61, %v82_v6  ;;  %v2348_v5 = vadd.f32 %v332_v62, %v2318_v7 }
  0xf5   :  { %v223_v10 = vpop.f32.mrf.mxu0  ;;  %v336_v11 = vpop.f32.mrf.mxu1 }
  0xf6   :  { %2781 = vst [vmem:[#allocation14_spill] sm:$0xff] %v2345_v4  ;;  %2782 = vst [vmem:[#allocation15_spill] sm:$0xff] %v2348_v5  ;;  %v2350_v18 = vadd.f32 %v223_v10, %v78_v2  ;;  %v2353_v23 = vadd.f32 %v336_v11, %v2316_v3 }
  0xf7   :  { %v225_v38 = vpop.f32.mrf.mxu0  ;;  %v338_v43 = vpop.f32.mrf.mxu1 }
  0xf8   :  { %2783 = vst [vmem:[#allocation16_spill] sm:$0xff] %v2350_v18  ;;  %2784 = vst [vmem:[#allocation17_spill] sm:$0xff] %v2353_v23  ;;  %v2355_v55 = vadd.f32 %v225_v38, %v82_v6  ;;  %v2358_v56 = vadd.f32 %v338_v43, %v2318_v7 }
  0xf9   :  { %v229_v0 = vpop.f32.mrf.mxu0  ;;  %v342_v61 = vpop.f32.mrf.mxu1 }
  0xfa   :  { %2785 = vst [vmem:[#allocation18_spill] sm:$0xff] %v2355_v55  ;;  %2786 = vst [vmem:[#allocation19_spill] sm:$0xff] %v2358_v56  ;;  %v2360_v53 = vadd.f32 %v229_v0, %v78_v2  ;;  %v2363_v62 = vadd.f32 %v342_v61, %v2316_v3 }
  0xfb   :  { %v231_v5 = vpop.f32.mrf.mxu0  ;;  %v344_v10 = vpop.f32.mrf.mxu1 }
  0xfc   :  { %2787 = vst [vmem:[#allocation20_spill] sm:$0xff] %v2360_v53  ;;  %2788 = vst [vmem:[#allocation21_spill] sm:$0xff] %v2363_v62  ;;  %v2365_v18 = vadd.f32 %v231_v5, %v82_v6  ;;  %v2368_v11 = vadd.f32 %v344_v10, %v2318_v7 }
  0xfd   :  { %v235_v23 = vpop.f32.mrf.mxu0  ;;  %v348_v38 = vpop.f32.mrf.mxu1 }
  0xfe   :  { %2789 = vst [vmem:[#allocation22_spill] sm:$0xff] %v2365_v18  ;;  %2790 = vst [vmem:[#allocation23_spill] sm:$0xff] %v2368_v11  ;;  %v2370_v55 = vadd.f32 %v235_v23, %v78_v2  ;;  %v2373_v43 = vadd.f32 %v348_v38, %v2316_v3 }
  0xff   :  { %v237_v56 = vpop.f32.mrf.mxu0  ;;  %v350_v0 = vpop.f32.mrf.mxu1 }
 0x100   :  { %2791 = vst [vmem:[#allocation24_spill] sm:$0xff] %v2370_v55  ;;  %2792 = vst [vmem:[#allocation25_spill] sm:$0xff] %v2373_v43  ;;  %v2375_v53 = vadd.f32 %v237_v56, %v82_v6  ;;  %v2378_v61 = vadd.f32 %v350_v0, %v2318_v7  ;;  %v200_v56 = vadd.f32 %v2308_v59, %v78_v2 }
 0x101   :  { %v241_v62 = vpop.f32.mrf.mxu0  ;;  %v354_v5 = vpop.f32.mrf.mxu1  ;;  %v202_v0 = vadd.f32 %v2312_v63, %v82_v6 }
 0x102   :  { %2793 = vst [vmem:[#allocation26_spill] sm:$0xff] %v2375_v53  ;;  %2794 = vst [vmem:[#allocation27_spill] sm:$0xff] %v2378_v61  ;;  %v2380_v18 = vadd.f32 %v241_v62, %v78_v2  ;;  %v2383_v10 = vadd.f32 %v354_v5, %v2316_v3  ;;  %v315_v2 = vadd.f32 %v2314_v1, %v2318_v7 }
 0x103   :  { %v243_v11 = vpop.f32.mrf.mxu0  ;;  %v356_v23 = vpop.f32.mrf.mxu1 }
 0x104   :  { %2795 = vst [vmem:[#allocation28_spill] sm:$0xff] %v2380_v18  ;;  %2796 = vst [vmem:[#allocation29_spill] sm:$0xff] %v2383_v10  ;;  %v2385_v55 = vadd.f32 %v243_v11, %v82_v6  ;;  %v2388_v38 = vadd.f32 %v356_v23, %v2318_v7  ;;  %v313_v23 = vadd.f32 %v2310_v60, %v2316_v3 }
 0x106   :  { %2797 = vst [vmem:[#allocation30_spill] sm:$0xff] %v2385_v55  ;;  %v621_v43 = vpop.f32.mrf.mxu0  ;;  %v662_v53 = vpop.f32.mrf.mxu1 }
 0x107   :  { %v669_v61 = vadd.f32 %v621_v43, %v200_v56  ;;  %v671_v59 = vadd.f32 %v662_v53, %v313_v23 }
 0x108   :  { %v623_v58 = vpop.f32.mrf.mxu0  ;;  %v664_v62 = vpop.f32.mrf.mxu1 }
 0x109   :  { %v1685_v18 = vmul.f32 -1.442695, %v669_v61  ;;  %v670_v4 = vadd.f32 %v623_v58, %v202_v0  ;;  %v1687_v63 = vmul.f32 -1.442695, %v671_v59  ;;  %v672_v43 = vadd.f32 %v664_v62, %v315_v2 }
 0x10a   :  { %v625_v5 = vpop.f32.mrf.mxu0  ;;  %v666_v10 = vpop.f32.mrf.mxu1 }
 0x10b   :  { %1820 = vpow2.f32 %v1685_v18  ;;  %v1686_v57 = vmul.f32 -1.442695, %v670_v4  ;;  %v2798_v5 = vmov 0  }
 0x10c   :  { %v626_v11 = vpop.f32.mrf.mxu0  ;;  %v667_v55 = vpop.f32.mrf.mxu1 }
 0x10d   :  { %1822 = vpow2.f32 %v1686_v57 }
 0x10e   :  { %1824 = vpow2.f32 %v1687_v63 }
 0x118   :  { %v1821_v6 = vpop.eup %1820 }
 0x119   :  { %v682_v56 = vadd.f32 1.0, %v1821_v6 }
 0x11a   :  { %v1823_v61 = vpop.eup %1822 }
 0x11b   :  { %1826 = vrcp.f32 %v682_v56  ;;  %v683_v58 = vadd.f32 1.0, %v1823_v61  ;;  %v1825_v4 = vpop.eup %1824 }
 0x11c   :  { %1828 = vtanh.f32 %v672_v43  ;;  %v684_v10 = vadd.f32 1.0, %v1825_v4 }
 0x11d   :  { %1830 = vrcp.f32 %v683_v58 }
 0x11e   :  { %1832 = vrcp.f32 %v684_v10 }
 0x128   :  { %v1827_v18 = vpop.eup %1826 }
 0x129   :  { %v1829_v57 = vpop.eup %1828 }
 0x12a   :  { %v1831_v55 = vpop.eup %1830  ;;  %v693_v53 = vmul.f32 %v1829_v57, %v1827_v18 }
 0x12b   :  { %v692_v60 = vmul.f32 0.0, %v1831_v55  ;;  %v1833_v1 = vpop.eup %1832 }
 0x12d   :  { %v2396_v3 = vadd.f32 %v693_v53, %v692_v60 }
 0x12f   :  { %1834 = vtanh.f32 %v2396_v3 }
 0x13c   :  { %v1835_v7 = vpop.eup %1834 }
 0x13d   :  { %v696_v0 = vmul.f32 %v1835_v7, %v1833_v1 }
 0x13f   :  { %v702_v62 = vpack.c.bf16 %v696_v0, %v696_v0 }
 0x141   :  { %736 = vmatmul.mubr.bf16.vlgmr.msra.gmra.mxu0 %v702_v62  ;;  %777 = vmatmul.mubr.bf16.vlgmr.msra.gmra.mxu1 %v702_v62 }
 0x142   :  { %820 = vmatpush1.bf16.msra.mxu0 %v2143_v16  ;;  %861 = vmatpush1.bf16.msra.mxu1 %v2145_v17 }
 0x143   :  { %821 = vmatprep.subr.bf16.mxu0 %v2151_v19  ;;  %862 = vmatprep.subr.bf16.mxu1 %v2155_v20 }
 0x144   :  { %851 = vmatprep.mubr.bf16.mxu0 %v2798_v5  ;;  %892 = vmatprep.mubr.bf16.mxu1 %v2798_v5 }
 0x146   :  { %822 = vmatpush1.bf16.msra.mxu0 %v2157_v21  ;;  %863 = vmatpush1.bf16.msra.mxu1 %v2159_v22 }
 0x147   :  { %823 = vmatprep.subr.bf16.mxu0 %v2167_v24  ;;  %864 = vmatprep.subr.bf16.mxu1 %v2169_v25 }
 0x14a   :  { %824 = vmatpush1.bf16.msra.mxu0 %v2171_v26  ;;  %865 = vmatpush1.bf16.msra.mxu1 %v2175_v27 }
 0x14b   :  { %825 = vmatprep.subr.bf16.mxu0 %v2181_v29  ;;  %866 = vmatprep.subr.bf16.mxu1 %v2183_v30 }
 0x14e   :  { %826 = vmatpush1.bf16.msra.mxu0 %v2187_v31  ;;  %867 = vmatpush1.bf16.msra.mxu1 %v2191_v32 }
 0x14f   :  { %827 = vmatprep.subr.bf16.mxu0 %v2197_v34  ;;  %868 = vmatprep.subr.bf16.mxu1 %v2201_v35 }
 0x152   :  { %828 = vmatpush1.bf16.msra.mxu0 %v2205_v36  ;;  %869 = vmatpush1.bf16.msra.mxu1 %v2207_v37 }
 0x153   :  { %829 = vmatprep.subr.bf16.mxu0 %v2215_v39  ;;  %870 = vmatprep.subr.bf16.mxu1 %v2217_v40 }
 0x156   :  { %830 = vmatpush1.bf16.msra.mxu0 %v2219_v41  ;;  %871 = vmatpush1.bf16.msra.mxu1 %v2223_v42 }
 0x157   :  { %831 = vmatprep.subr.bf16.mxu0 %v2231_v44  ;;  %872 = vmatprep.subr.bf16.mxu1 %v2233_v45 }
 0x15a   :  { %832 = vmatpush1.bf16.msra.mxu0 %v2237_v46  ;;  %873 = vmatpush1.bf16.msra.mxu1 %v2239_v47 }
 0x15b   :  { %833 = vmatprep.subr.bf16.mxu0 %v2247_v49  ;;  %874 = vmatprep.subr.bf16.mxu1 %v2249_v50 }
 0x15e   :  { %834 = vmatpush1.bf16.msra.mxu0 %v2253_v51  ;;  %875 = vmatpush1.bf16.msra.mxu1 %v2255_v52 }
 0x15f   :  { %935 = vmatprep.subr.bf16.mxu0 %v2139_v14  ;;  %976 = vmatprep.subr.bf16.mxu1 %v2141_v15 }
 0x201   :  { %v737_v11 = vpop.f32.mrf.mxu0  ;;  %v778_v23 = vpop.f32.mrf.mxu1 }
 0x202   :  { %v785_v59 = vadd.f32 %v737_v11, %v2320_v8  ;;  %v787_v57 = vadd.f32 %v778_v23, %v2323_v9 }
 0x203   :  { %v739_v2 = vpop.f32.mrf.mxu0  ;;  %v780_v63 = vpop.f32.mrf.mxu1 }
 0x204   :  { %v1688_v6 = vmul.f32 -1.442695, %v785_v59  ;;  %v786_v43 = vadd.f32 %v739_v2, %v2325_v12  ;;  %v1690_v55 = vmul.f32 -1.442695, %v787_v57  ;;  %v788_v10 = vadd.f32 %v780_v63, %v2328_v13 }
 0x205   :  { %v741_v56 = vpop.f32.mrf.mxu0  ;;  %v782_v61 = vpop.f32.mrf.mxu1 }
 0x206   :  { %1836 = vpow2.f32 %v1688_v6  ;;  %v1689_v58 = vmul.f32 -1.442695, %v786_v43 }
 0x207   :  { %v742_v4 = vpop.f32.mrf.mxu0  ;;  %v783_v18 = vpop.f32.mrf.mxu1 }
 0x208   :  { %1838 = vpow2.f32 %v1689_v58 }
 0x209   :  { %1840 = vpow2.f32 %v1690_v55 }
 0x20a   :  { %1842 = vtanh.f32 %v788_v10 }
 0x213   :  { %v1837_v60 = vpop.eup %1836 }
 0x214   :  { %v798_v53 = vadd.f32 1.0, %v1837_v60 }
 0x215   :  { %v1839_v8 = vpop.eup %1838 }
 0x216   :  { %1844 = vrcp.f32 %v798_v53  ;;  %v799_v1 = vadd.f32 1.0, %v1839_v8  ;;  %v1841_v12 = vpop.eup %1840 }
 0x217   :  { %v1843_v7 = vpop.eup %1842  ;;  %v800_v59 = vadd.f32 1.0, %v1841_v12 }
 0x218   :  { %1846 = vrcp.f32 %v799_v1 }
 0x219   :  { %1848 = vrcp.f32 %v800_v59 }
 0x223   :  { %v1845_v0 = vpop.eup %1844 }
 0x224   :  { %v809_v62 = vmul.f32 %v1845_v0, %v1843_v7 }
 0x225   :  { %v1847_v11 = vpop.eup %1846 }
 0x226   :  { %v808_v2 = vmul.f32 %v1847_v11, %v2396_v3  ;;  %v1849_v13 = vpop.eup %1848 }
 0x228   :  { %v2438_v9 = vadd.f32 %v809_v62, %v808_v2 }
 0x22a   :  { %1850 = vtanh.f32 %v2438_v9 }
 0x237   :  { %v1851_v23 = vpop.eup %1850 }
 0x238   :  { %v812_v63 = vmul.f32 %v1851_v23, %v1849_v13 }
 0x23a   :  { %v818_v6 = vpack.c.bf16 %v812_v63, %v812_v63 }
 0x23c   :  { %852 = vmatmul.mubr.bf16.vlgmr.msra.gmra.mxu0 %v818_v6  ;;  %893 = vmatmul.mubr.bf16.vlgmr.msra.gmra.mxu1 %v818_v6 }
 0x23d   :  { %936 = vmatpush1.bf16.msra.mxu0 %v2143_v16  ;;  %977 = vmatpush1.bf16.msra.mxu1 %v2145_v17 }
 0x23e   :  { %937 = vmatprep.subr.bf16.mxu0 %v2151_v19  ;;  %978 = vmatprep.subr.bf16.mxu1 %v2155_v20 }
 0x23f   :  { %967 = vmatprep.mubr.bf16.mxu0 %v2798_v5  ;;  %1008 = vmatprep.mubr.bf16.mxu1 %v2798_v5 }
 0x241   :  { %938 = vmatpush1.bf16.msra.mxu0 %v2157_v21  ;;  %979 = vmatpush1.bf16.msra.mxu1 %v2159_v22 }
 0x242   :  { %939 = vmatprep.subr.bf16.mxu0 %v2167_v24  ;;  %980 = vmatprep.subr.bf16.mxu1 %v2169_v25 }
 0x245   :  { %940 = vmatpush1.bf16.msra.mxu0 %v2171_v26  ;;  %981 = vmatpush1.bf16.msra.mxu1 %v2175_v27 }
 0x246   :  { %941 = vmatprep.subr.bf16.mxu0 %v2181_v29  ;;  %982 = vmatprep.subr.bf16.mxu1 %v2183_v30 }
 0x249   :  { %942 = vmatpush1.bf16.msra.mxu0 %v2187_v31  ;;  %983 = vmatpush1.bf16.msra.mxu1 %v2191_v32 }
 0x24a   :  { %943 = vmatprep.subr.bf16.mxu0 %v2197_v34  ;;  %984 = vmatprep.subr.bf16.mxu1 %v2201_v35 }
 0x24d   :  { %944 = vmatpush1.bf16.msra.mxu0 %v2205_v36  ;;  %985 = vmatpush1.bf16.msra.mxu1 %v2207_v37 }
 0x24e   :  { %945 = vmatprep.subr.bf16.mxu0 %v2215_v39  ;;  %986 = vmatprep.subr.bf16.mxu1 %v2217_v40 }
 0x251   :  { %946 = vmatpush1.bf16.msra.mxu0 %v2219_v41  ;;  %987 = vmatpush1.bf16.msra.mxu1 %v2223_v42 }
 0x252   :  { %947 = vmatprep.subr.bf16.mxu0 %v2231_v44  ;;  %988 = vmatprep.subr.bf16.mxu1 %v2233_v45 }
 0x255   :  { %948 = vmatpush1.bf16.msra.mxu0 %v2237_v46  ;;  %989 = vmatpush1.bf16.msra.mxu1 %v2239_v47 }
 0x256   :  { %949 = vmatprep.subr.bf16.mxu0 %v2247_v49  ;;  %990 = vmatprep.subr.bf16.mxu1 %v2249_v50 }
 0x259   :  { %950 = vmatpush1.bf16.msra.mxu0 %v2253_v51  ;;  %991 = vmatpush1.bf16.msra.mxu1 %v2255_v52 }
 0x25a   :  { %1051 = vmatprep.subr.bf16.mxu0 %v2139_v14  ;;  %1092 = vmatprep.subr.bf16.mxu1 %v2141_v15 }
 0x2fc   :  { %v853_v3 = vpop.f32.mrf.mxu0  ;;  %v894_v43 = vpop.f32.mrf.mxu1 }
 0x2fd   :  { %v901_v56 = vadd.f32 %v853_v3, %v2330_v28  ;;  %v903_v8 = vadd.f32 %v894_v43, %v2333_v33 }
 0x2fe   :  { %v855_v61 = vpop.f32.mrf.mxu0  ;;  %v896_v58 = vpop.f32.mrf.mxu1 }
 0x2ff   :  { %v1691_v4 = vmul.f32 -1.442695, %v901_v56  ;;  %v902_v18 = vadd.f32 %v855_v61, %v2335_v48  ;;  %v1693_v1 = vmul.f32 -1.442695, %v903_v8  ;;  %v904_v12 = vadd.f32 %v896_v58, %v2338_v54  ;;  %v2799_v61 = vld [vmem:[#allocation12_spill] sm:$0xff] }
 0x300   :  { %v857_v57 = vpop.f32.mrf.mxu0  ;;  %v898_v55 = vpop.f32.mrf.mxu1 }
 0x301   :  { %1852 = vpow2.f32 %v1691_v4  ;;  %v1692_v10 = vmul.f32 -1.442695, %v902_v18  ;;  %v2800_v55 = vld [vmem:[#allocation14_spill] sm:$0xff] }
 0x302   :  { %v858_v60 = vpop.f32.mrf.mxu0  ;;  %v899_v53 = vpop.f32.mrf.mxu1 }
 0x303   :  { %1854 = vpow2.f32 %v1692_v10 }
 0x304   :  { %1856 = vpow2.f32 %v1693_v1 }
 0x305   :  { %1858 = vtanh.f32 %v904_v12 }
 0x30e   :  { %v1853_v7 = vpop.eup %1852 }
 0x30f   :  { %v914_v0 = vadd.f32 1.0, %v1853_v7  ;;  %v2801_v7 = vld [vmem:[#allocation13_spill] sm:$0xff] }
 0x310   :  { %v1855_v28 = vpop.eup %1854 }
 0x311   :  { %1860 = vrcp.f32 %v914_v0  ;;  %v915_v62 = vadd.f32 1.0, %v1855_v28  ;;  %v1857_v48 = vpop.eup %1856 }
 0x312   :  { %v1859_v11 = vpop.eup %1858  ;;  %v916_v23 = vadd.f32 1.0, %v1857_v48 }
 0x313   :  { %1862 = vrcp.f32 %v915_v62 }
 0x314   :  { %1864 = vrcp.f32 %v916_v23 }
 0x31e   :  { %v1861_v59 = vpop.eup %1860 }
 0x31f   :  { %v925_v2 = vmul.f32 %v1861_v59, %v1859_v11 }
 0x320   :  { %v1863_v13 = vpop.eup %1862 }
 0x321   :  { %v924_v63 = vmul.f32 %v1863_v13, %v2438_v9  ;;  %v1865_v54 = vpop.eup %1864 }
 0x323   :  { %v2480_v33 = vadd.f32 %v925_v2, %v924_v63 }
 0x325   :  { %1866 = vtanh.f32 %v2480_v33 }
 0x332   :  { %v1867_v6 = vpop.eup %1866 }
 0x333   :  { %v928_v3 = vmul.f32 %v1867_v6, %v1865_v54 }
 0x335   :  { %v934_v43 = vpack.c.bf16 %v928_v3, %v928_v3 }
 0x337   :  { %968 = vmatmul.mubr.bf16.vlgmr.msra.gmra.mxu0 %v934_v43  ;;  %1009 = vmatmul.mubr.bf16.vlgmr.msra.gmra.mxu1 %v934_v43 }
 0x338   :  { %1052 = vmatpush1.bf16.msra.mxu0 %v2143_v16  ;;  %1093 = vmatpush1.bf16.msra.mxu1 %v2145_v17 }
 0x339   :  { %1053 = vmatprep.subr.bf16.mxu0 %v2151_v19  ;;  %1094 = vmatprep.subr.bf16.mxu1 %v2155_v20 }
 0x33a   :  { %1083 = vmatprep.mubr.bf16.mxu0 %v2798_v5  ;;  %1124 = vmatprep.mubr.bf16.mxu1 %v2798_v5 }
 0x33c   :  { %1054 = vmatpush1.bf16.msra.mxu0 %v2157_v21  ;;  %1095 = vmatpush1.bf16.msra.mxu1 %v2159_v22 }
 0x33d   :  { %1055 = vmatprep.subr.bf16.mxu0 %v2167_v24  ;;  %1096 = vmatprep.subr.bf16.mxu1 %v2169_v25 }
 0x340   :  { %1056 = vmatpush1.bf16.msra.mxu0 %v2171_v26  ;;  %1097 = vmatpush1.bf16.msra.mxu1 %v2175_v27 }
 0x341   :  { %1057 = vmatprep.subr.bf16.mxu0 %v2181_v29  ;;  %1098 = vmatprep.subr.bf16.mxu1 %v2183_v30 }
 0x344   :  { %1058 = vmatpush1.bf16.msra.mxu0 %v2187_v31  ;;  %1099 = vmatpush1.bf16.msra.mxu1 %v2191_v32 }
 0x345   :  { %1059 = vmatprep.subr.bf16.mxu0 %v2197_v34  ;;  %1100 = vmatprep.subr.bf16.mxu1 %v2201_v35 }
 0x348   :  { %1060 = vmatpush1.bf16.msra.mxu0 %v2205_v36  ;;  %1101 = vmatpush1.bf16.msra.mxu1 %v2207_v37 }
 0x349   :  { %1061 = vmatprep.subr.bf16.mxu0 %v2215_v39  ;;  %1102 = vmatprep.subr.bf16.mxu1 %v2217_v40 }
 0x34c   :  { %1062 = vmatpush1.bf16.msra.mxu0 %v2219_v41  ;;  %1103 = vmatpush1.bf16.msra.mxu1 %v2223_v42 }
 0x34d   :  { %1063 = vmatprep.subr.bf16.mxu0 %v2231_v44  ;;  %1104 = vmatprep.subr.bf16.mxu1 %v2233_v45 }
 0x350   :  { %1064 = vmatpush1.bf16.msra.mxu0 %v2237_v46  ;;  %1105 = vmatpush1.bf16.msra.mxu1 %v2239_v47 }
 0x351   :  { %1065 = vmatprep.subr.bf16.mxu0 %v2247_v49  ;;  %1106 = vmatprep.subr.bf16.mxu1 %v2249_v50 }
 0x354   :  { %1066 = vmatpush1.bf16.msra.mxu0 %v2253_v51  ;;  %1107 = vmatpush1.bf16.msra.mxu1 %v2255_v52 }
 0x355   :  { %1167 = vmatprep.subr.bf16.mxu0 %v2139_v14  ;;  %1208 = vmatprep.subr.bf16.mxu1 %v2141_v15  ;;  %v2802_v15 = vld [vmem:[#allocation15_spill] sm:$0xff] }
 0x3f7   :  { %v969_v9 = vpop.f32.mrf.mxu0  ;;  %v1010_v56 = vpop.f32.mrf.mxu1 }
 0x3f8   :  { %v1017_v58 = vadd.f32 %v969_v9, %v2799_v61  ;;  %v1019_v14 = vadd.f32 %v1010_v56, %v2801_v7 }
 0x3f9   :  { %v971_v4 = vpop.f32.mrf.mxu0  ;;  %v1012_v18 = vpop.f32.mrf.mxu1 }
 0x3fa   :  { %v1694_v57 = vmul.f32 -1.442695, %v1017_v58  ;;  %v1018_v10 = vadd.f32 %v971_v4, %v2800_v55  ;;  %v1696_v0 = vmul.f32 -1.442695, %v1019_v14  ;;  %v1020_v28 = vadd.f32 %v1012_v18, %v2802_v15 }
 0x3fb   :  { %v973_v60 = vpop.f32.mrf.mxu0  ;;  %v1014_v53 = vpop.f32.mrf.mxu1 }
 0x3fc   :  { %1868 = vpow2.f32 %v1694_v57  ;;  %v1695_v8 = vmul.f32 -1.442695, %v1018_v10 }
 0x3fd   :  { %v974_v1 = vpop.f32.mrf.mxu0  ;;  %v1015_v12 = vpop.f32.mrf.mxu1 }
 0x3fe   :  { %1870 = vpow2.f32 %v1695_v8 }
 0x3ff   :  { %1872 = vpow2.f32 %v1696_v0 }
 0x400   :  { %1874 = vtanh.f32 %v1020_v28  ;;  %v2571_v28 = vld [vmem:[#allocation6 + $0xe0] ss:$16 sps:$4 sm:$0xff]  }
 0x409   :  { %v1869_v62 = vpop.eup %1868 }
 0x40a   :  { %v1030_v48 = vadd.f32 1.0, %v1869_v62  ;;  %v2574_v62 = vld [vmem:[#allocation6 + $0xe8] ss:$16 sps:$4 sm:$0xff]  }
 0x40b   :  { %v1871_v11 = vpop.eup %1870 }
 0x40c   :  { %1876 = vrcp.f32 %v1030_v48  ;;  %v1031_v59 = vadd.f32 1.0, %v1871_v11  ;;  %v1873_v2 = vpop.eup %1872  ;;  %v2577_v48 = vld [vmem:[#allocation6 + $0xc4] ss:$16 sps:$4 sm:$0xff]   ;;  %v2580_v11 = vld [vmem:[#allocation6 + $0xcc] ss:$16 sps:$4 sm:$0xff]  }
 0x40d   :  { %v1875_v13 = vpop.eup %1874  ;;  %v1032_v6 = vadd.f32 1.0, %v1873_v2  ;;  %v2588_v2 = vld [vmem:[#allocation6 + $0xc8] ss:$16 sps:$4 sm:$0xff]  }
 0x40e   :  { %1878 = vrcp.f32 %v1031_v59  ;;  %v2585_v59 = vld [vmem:[#allocation6 + $0xc0] ss:$16 sps:$4 sm:$0xff]  }
 0x40f   :  { %1880 = vrcp.f32 %v1032_v6  ;;  %v2603_v6 = vld [vmem:[#allocation6 + $0x84] ss:$16 sps:$4 sm:$0xff]  }
 0x419   :  { %v1877_v23 = vpop.eup %1876 }
 0x41a   :  { %v1041_v63 = vmul.f32 %v1877_v23, %v1875_v13  ;;  %v2591_v13 = vld [vmem:[#allocation6 + $0xa4] ss:$16 sps:$4 sm:$0xff]   ;;  %v2594_v23 = vld [vmem:[#allocation6 + $0xac] ss:$16 sps:$4 sm:$0xff]  }
 0x41b   :  { %v1879_v54 = vpop.eup %1878 }
 0x41c   :  { %v1040_v3 = vmul.f32 %v1879_v54, %v2480_v33  ;;  %v1881_v9 = vpop.eup %1880  ;;  %v2600_v54 = vld [vmem:[#allocation6 + $0xa8] ss:$16 sps:$4 sm:$0xff]  }
 0x41e   :  { %v2522_v43 = vadd.f32 %v1041_v63, %v1040_v3  ;;  %v2597_v63 = vld [vmem:[#allocation6 + $0xa0] ss:$16 sps:$4 sm:$0xff]   ;;  %v2606_v3 = vld [vmem:[#allocation6 + $0x8c] ss:$16 sps:$4 sm:$0xff]  }
 0x420   :  { %1882 = vtanh.f32 %v2522_v43 }
 0x42d   :  { %v1883_v56 = vpop.eup %1882 }
 0x42e   :  { %v1044_v61 = vmul.f32 %v1883_v56, %v1881_v9  ;;  %v2612_v9 = vld [vmem:[#allocation6 + $0x88] ss:$16 sps:$4 sm:$0xff]   ;;  %v2615_v56 = vld [vmem:[#allocation6 + $0x64] ss:$16 sps:$4 sm:$0xff]  }
 0x430   :  { %v1050_v58 = vpack.c.bf16 %v1044_v61, %v1044_v61  ;;  %v2618_v61 = vld [vmem:[#allocation6 + $0x6c] ss:$16 sps:$4 sm:$0xff]  }
 0x432   :  { %1084 = vmatmul.mubr.bf16.vlgmr.msra.gmra.mxu0 %v1050_v58  ;;  %1125 = vmatmul.mubr.bf16.vlgmr.msra.gmra.mxu1 %v1050_v58  ;;  %v2621_v58 = vld [vmem:[#allocation6 + $0x60] ss:$16 sps:$4 sm:$0xff]  }
 0x433   :  { %1168 = vmatpush1.bf16.msra.mxu0 %v2143_v16  ;;  %1209 = vmatpush1.bf16.msra.mxu1 %v2145_v17  ;;  %v2557_v16 = vld [vmem:[#allocation6 + $0xe4] ss:$16 sps:$4 sm:$0xff]   ;;  %v2560_v17 = vld [vmem:[#allocation6 + $0xec] ss:$16 sps:$4 sm:$0xff]  }
 0x434   :  { %1169 = vmatprep.subr.bf16.mxu0 %v2151_v19  ;;  %1210 = vmatprep.subr.bf16.mxu1 %v2155_v20 }
 0x435   :  { %1199 = vmatprep.mubr.bf16.mxu0 %v2798_v5  ;;  %1240 = vmatprep.mubr.bf16.mxu1 %v2798_v5 }
 0x437   :  { %1170 = vmatpush1.bf16.msra.mxu0 %v2157_v21  ;;  %1211 = vmatpush1.bf16.msra.mxu1 %v2159_v22  ;;  %v2803_v21 = vld [vmem:[#allocation16_spill] sm:$0xff] }
 0x438   :  { %1171 = vmatprep.subr.bf16.mxu0 %v2167_v24  ;;  %1212 = vmatprep.subr.bf16.mxu1 %v2169_v25 }
 0x43b   :  { %1172 = vmatpush1.bf16.msra.mxu0 %v2171_v26  ;;  %1213 = vmatpush1.bf16.msra.mxu1 %v2175_v27  ;;  %v2804_v27 = vld [vmem:[#allocation18_spill] sm:$0xff] }
 0x43c   :  { %1173 = vmatprep.subr.bf16.mxu0 %v2181_v29  ;;  %1214 = vmatprep.subr.bf16.mxu1 %v2183_v30 }
 0x43f   :  { %1174 = vmatpush1.bf16.msra.mxu0 %v2187_v31  ;;  %1215 = vmatpush1.bf16.msra.mxu1 %v2191_v32 }
 0x440   :  { %1175 = vmatprep.subr.bf16.mxu0 %v2197_v34  ;;  %1216 = vmatprep.subr.bf16.mxu1 %v2201_v35 }
 0x443   :  { %1176 = vmatpush1.bf16.msra.mxu0 %v2205_v36  ;;  %1217 = vmatpush1.bf16.msra.mxu1 %v2207_v37  ;;  %v2805_v36 = vld [vmem:[#allocation17_spill] sm:$0xff] }
 0x444   :  { %1177 = vmatprep.subr.bf16.mxu0 %v2215_v39  ;;  %1218 = vmatprep.subr.bf16.mxu1 %v2217_v40  ;;  %v2806_v40 = vld [vmem:[#allocation19_spill] sm:$0xff] }
 0x447   :  { %1178 = vmatpush1.bf16.msra.mxu0 %v2219_v41  ;;  %1219 = vmatpush1.bf16.msra.mxu1 %v2223_v42 }
 0x448   :  { %1179 = vmatprep.subr.bf16.mxu0 %v2231_v44  ;;  %1220 = vmatprep.subr.bf16.mxu1 %v2233_v45 }
 0x44b   :  { %1180 = vmatpush1.bf16.msra.mxu0 %v2237_v46  ;;  %1221 = vmatpush1.bf16.msra.mxu1 %v2239_v47 }
 0x44c   :  { %1181 = vmatprep.subr.bf16.mxu0 %v2247_v49  ;;  %1222 = vmatprep.subr.bf16.mxu1 %v2249_v50 }
 0x44f   :  { %1182 = vmatpush1.bf16.msra.mxu0 %v2253_v51  ;;  %1223 = vmatpush1.bf16.msra.mxu1 %v2255_v52 }
 0x450   :  { %1283 = vmatprep.subr.bf16.mxu0 %v2557_v16  ;;  %1324 = vmatprep.subr.bf16.mxu1 %v2560_v17 }
 0x4f2   :  { %v1085_v19 = vpop.f32.mrf.mxu0  ;;  %v1126_v20 = vpop.f32.mrf.mxu1 }
 0x4f3   :  { %v1133_v22 = vadd.f32 %v1085_v19, %v2803_v21  ;;  %v1135_v37 = vadd.f32 %v1126_v20, %v2805_v36  ;;  %v2624_v19 = vld [vmem:[#allocation6 + $0x68] ss:$16 sps:$4 sm:$0xff]   ;;  %v2627_v20 = vld [vmem:[#allocation6 + $0x44] ss:$16 sps:$4 sm:$0xff]   ;;  %v2630_v21 = vld [vmem:[#allocation6 + $0x4c] ss:$16 sps:$4 sm:$0xff]  }
 0x4f4   :  { %v1087_v24 = vpop.f32.mrf.mxu0  ;;  %v1128_v25 = vpop.f32.mrf.mxu1 }
 0x4f5   :  { %v1697_v26 = vmul.f32 -1.442695, %v1133_v22  ;;  %v1134_v29 = vadd.f32 %v1087_v24, %v2804_v27  ;;  %v1699_v39 = vmul.f32 -1.442695, %v1135_v37  ;;  %v1136_v41 = vadd.f32 %v1128_v25, %v2806_v40  ;;  %v2633_v22 = vld [vmem:[#allocation6 + $0x40] ss:$16 sps:$4 sm:$0xff]  }
 0x4f6   :  { %v1089_v30 = vpop.f32.mrf.mxu0  ;;  %v1130_v31 = vpop.f32.mrf.mxu1  ;;  %v2636_v24 = vld [vmem:[#allocation6 + $0x48] ss:$16 sps:$4 sm:$0xff]  }
 0x4f7   :  { %1884 = vpow2.f32 %v1697_v26  ;;  %v1698_v32 = vmul.f32 -1.442695, %v1134_v29  ;;  %v2807_v26 = vld [vmem:[#allocation20_spill] sm:$0xff] }
 0x4f8   :  { %v1090_v34 = vpop.f32.mrf.mxu0  ;;  %v1131_v35 = vpop.f32.mrf.mxu1 }
 0x4f9   :  { %1886 = vpow2.f32 %v1698_v32 }
 0x4fa   :  { %1888 = vpow2.f32 %v1699_v39 }
 0x4fb   :  { %1890 = vtanh.f32 %v1136_v41 }
 0x504   :  { %v1885_v42 = vpop.eup %1884 }
 0x505   :  { %v1146_v33 = vadd.f32 1.0, %v1885_v42 }
 0x506   :  { %v1887_v4 = vpop.eup %1886 }
 0x507   :  { %1892 = vrcp.f32 %v1146_v33  ;;  %v1147_v18 = vadd.f32 1.0, %v1887_v4  ;;  %v1889_v57 = vpop.eup %1888 }
 0x508   :  { %v1891_v55 = vpop.eup %1890  ;;  %v1148_v8 = vadd.f32 1.0, %v1889_v57 }
 0x509   :  { %1894 = vrcp.f32 %v1147_v18 }
 0x50a   :  { %1896 = vrcp.f32 %v1148_v8 }
 0x514   :  { %v1893_v10 = vpop.eup %1892 }
 0x515   :  { %v1157_v60 = vmul.f32 %v1893_v10, %v1891_v55 }
 0x516   :  { %v1895_v53 = vpop.eup %1894 }
 0x517   :  { %v1156_v1 = vmul.f32 %v1895_v53, %v2522_v43  ;;  %v1897_v7 = vpop.eup %1896  ;;  %v2609_v43 = vld [vmem:[#allocation6 + $0x80] ss:$16 sps:$4 sm:$0xff]  }
 0x519   :  { %v2568_v12 = vadd.f32 %v1157_v60, %v1156_v1 }
 0x51b   :  { %1898 = vtanh.f32 %v2568_v12 }
 0x528   :  { %v1899_v14 = vpop.eup %1898 }
 0x529   :  { %v1160_v0 = vmul.f32 %v1899_v14, %v1897_v7  ;;  %v1978_v7 = vld [vmem:[#allocation6 + $0x20] ss:$16 sps:$4 sm:$0xff]   ;;  %v1979_v14 = vld [vmem:[#allocation6 + $0x28] ss:$16 sps:$4 sm:$0xff]  }
 0x52b   :  { %v1166_v15 = vpack.c.bf16 %v1160_v0, %v1160_v0  ;;  %v1980_v0 = vld [vmem:[#allocation6 + $0x4] ss:$16 sps:$4 sm:$0xff]  }
 0x52d   :  { %1200 = vmatmul.mubr.bf16.vlgmr.msra.gmra.mxu0 %v1166_v15  ;;  %1241 = vmatmul.mubr.bf16.vlgmr.msra.gmra.mxu1 %v1166_v15  ;;  %v1981_v15 = vld [vmem:[#allocation6 + $0xc] ss:$16 sps:$4 sm:$0xff]  }
 0x52e   :  { %1284 = vmatpush1.bf16.msra.mxu0 %v2571_v28  ;;  %1325 = vmatpush1.bf16.msra.mxu1 %v2574_v62 }
 0x52f   :  { %1285 = vmatprep.subr.bf16.mxu0 %v2577_v48  ;;  %1326 = vmatprep.subr.bf16.mxu1 %v2580_v11 }
 0x530   :  { %1315 = vmatprep.mubr.bf16.mxu0 %v2798_v5  ;;  %1356 = vmatprep.mubr.bf16.mxu1 %v2798_v5 }
 0x532   :  { %1286 = vmatpush1.bf16.msra.mxu0 %v2585_v59  ;;  %1327 = vmatpush1.bf16.msra.mxu1 %v2588_v2 }
 0x533   :  { %1287 = vmatprep.subr.bf16.mxu0 %v2591_v13  ;;  %1328 = vmatprep.subr.bf16.mxu1 %v2594_v23 }
 0x536   :  { %1288 = vmatpush1.bf16.msra.mxu0 %v2597_v63  ;;  %1329 = vmatpush1.bf16.msra.mxu1 %v2600_v54 }
 0x537   :  { %1289 = vmatprep.subr.bf16.mxu0 %v2603_v6  ;;  %1330 = vmatprep.subr.bf16.mxu1 %v2606_v3 }
 0x53a   :  { %1290 = vmatpush1.bf16.msra.mxu0 %v2609_v43  ;;  %1331 = vmatpush1.bf16.msra.mxu1 %v2612_v9 }
 0x53b   :  { %1291 = vmatprep.subr.bf16.mxu0 %v2615_v56  ;;  %1332 = vmatprep.subr.bf16.mxu1 %v2618_v61 }
 0x53e   :  { %1292 = vmatpush1.bf16.msra.mxu0 %v2621_v58  ;;  %1333 = vmatpush1.bf16.msra.mxu1 %v2624_v19 }
 0x53f   :  { %1293 = vmatprep.subr.bf16.mxu0 %v2627_v20  ;;  %1334 = vmatprep.subr.bf16.mxu1 %v2630_v21 }
 0x542   :  { %1294 = vmatpush1.bf16.msra.mxu0 %v2633_v22  ;;  %1335 = vmatpush1.bf16.msra.mxu1 %v2636_v24 }
 0x543   :  { %1295 = vmatprep.subr.bf16.mxu0 %v2231_v44  ;;  %1336 = vmatprep.subr.bf16.mxu1 %v2233_v45 }
 0x546   :  { %1296 = vmatpush1.bf16.msra.mxu0 %v2237_v46  ;;  %1337 = vmatpush1.bf16.msra.mxu1 %v2239_v47  ;;  %v2808_v47 = vld [vmem:[#allocation22_spill] sm:$0xff] }
 0x547   :  { %1297 = vmatprep.subr.bf16.mxu0 %v2247_v49  ;;  %1338 = vmatprep.subr.bf16.mxu1 %v2249_v50 }
 0x54a   :  { %1298 = vmatpush1.bf16.msra.mxu0 %v2253_v51  ;;  %1339 = vmatpush1.bf16.msra.mxu1 %v2255_v52  ;;  %v2809_v52 = vld [vmem:[#allocation21_spill] sm:$0xff] }
 0x54b   :  { %1399 = vmatprep.subr.bf16.mxu0 %v2557_v16  ;;  %1440 = vmatprep.subr.bf16.mxu1 %v2560_v17  ;;  %v2810_v17 = vld [vmem:[#allocation23_spill] sm:$0xff] }
 0x5ed   :  { %v1201_v25 = vpop.f32.mrf.mxu0  ;;  %v1242_v44 = vpop.f32.mrf.mxu1 }
 0x5ee   :  { %v1249_v45 = vadd.f32 %v1201_v25, %v2807_v26  ;;  %v1251_v16 = vadd.f32 %v1242_v44, %v2809_v52 }
 0x5ef   :  { %v1203_v27 = vpop.f32.mrf.mxu0  ;;  %v1244_v46 = vpop.f32.mrf.mxu1 }
 0x5f0   :  { %v1700_v29 = vmul.f32 -1.442695, %v1249_v45  ;;  %v1250_v30 = vadd.f32 %v1203_v27, %v2808_v47  ;;  %v1702_v34 = vmul.f32 -1.442695, %v1251_v16  ;;  %v1252_v35 = vadd.f32 %v1244_v46, %v2810_v17  ;;  %v1523_v17 = vld [vmem:[%s2772_s4 + $0x70] sm:$0xff] }
 0x5f1   :  { %v1205_v49 = vpop.f32.mrf.mxu0  ;;  %v1246_v31 = vpop.f32.mrf.mxu1 }
 0x5f2   :  { %1900 = vpow2.f32 %v1700_v29  ;;  %v1701_v50 = vmul.f32 -1.442695, %v1250_v30 }
 0x5f3   :  { %v1206_v51 = vpop.f32.mrf.mxu0  ;;  %v1247_v32 = vpop.f32.mrf.mxu1 }
 0x5f4   :  { %1902 = vpow2.f32 %v1701_v50 }
 0x5f5   :  { %1904 = vpow2.f32 %v1702_v34  ;;  %v1524_v34 = vld [vmem:[%s2772_s4 + $0x78] sm:$0xff] }
 0x5f6   :  { %1906 = vtanh.f32 %v1252_v35  ;;  %v1522_v35 = vld [vmem:[%s2772_s4 + $0x68] sm:$0xff] }
 0x5ff   :  { %v1901_v36 = vpop.eup %1900 }
 0x600   :  { %v1262_v37 = vadd.f32 1.0, %v1901_v36  ;;  %v1521_v36 = vld [vmem:[%s2772_s4 + $0x60] sm:$0xff] }
 0x601   :  { %v1903_v39 = vpop.eup %1902 }
 0x602   :  { %1908 = vrcp.f32 %v1262_v37  ;;  %v1263_v40 = vadd.f32 1.0, %v1903_v39  ;;  %v1905_v41 = vpop.eup %1904  ;;  %v1520_v37 = vld [vmem:[%s2772_s4 + $0x58] sm:$0xff]  ;;  %v1519_v39 = vld [vmem:[%s2772_s4 + $0x50] sm:$0xff] }
 0x603   :  { %v1907_v42 = vpop.eup %1906  ;;  %v1264_v57 = vadd.f32 1.0, %v1905_v41  ;;  %v1517_v41 = vld [vmem:[%s2772_s4 + $0x40] sm:$0xff] }
 0x604   :  { %1910 = vrcp.f32 %v1263_v40  ;;  %v1518_v40 = vld [vmem:[%s2772_s4 + $0x48] sm:$0xff] }
 0x605   :  { %1912 = vrcp.f32 %v1264_v57  ;;  %v1512_v57 = vld [vmem:[%s2772_s4 + $0x18] sm:$0xff] }
 0x60f   :  { %v1909_v33 = vpop.eup %1908 }
 0x610   :  { %v1273_v4 = vmul.f32 %v1909_v33, %v1907_v42  ;;  %v1516_v42 = vld [vmem:[%s2772_s4 + $0x38] sm:$0xff]  ;;  %v1515_v33 = vld [vmem:[%s2772_s4 + $0x30] sm:$0xff] }
 0x611   :  { %v1911_v18 = vpop.eup %1910 }
 0x612   :  { %v1272_v55 = vmul.f32 %v1911_v18, %v2568_v12  ;;  %v1913_v60 = vpop.eup %1912  ;;  %v1977_v12 = vld [vmem:[#allocation6 + $0x2c] ss:$16 sps:$4 sm:$0xff]   ;;  %v1513_v18 = vld [vmem:[%s2772_s4 + $0x20] sm:$0xff] }
 0x614   :  { %v2654_v10 = vadd.f32 %v1273_v4, %v1272_v55  ;;  %v1514_v4 = vld [vmem:[%s2772_s4 + $0x28] sm:$0xff]  ;;  %v1511_v55 = vld [vmem:[%s2772_s4 + $0x10] sm:$0xff] }
 0x616   :  { %1914 = vtanh.f32 %v2654_v10 }
 0x623   :  { %v1915_v53 = vpop.eup %1914 }
 0x624   :  { %v1276_v8 = vmul.f32 %v1915_v53, %v1913_v60  ;;  %v1509_v60 = vld [vmem:[%s2772_s4] sm:$0xff] }
 0x626   :  { %v1282_v1 = vpack.c.bf16 %v1276_v8, %v1276_v8 }
 0x628   :  { %1316 = vmatmul.mubr.bf16.vlgmr.msra.gmra.mxu0 %v1282_v1  ;;  %1357 = vmatmul.mubr.bf16.vlgmr.msra.gmra.mxu1 %v1282_v1  ;;  %v2816_v1 = vld [vmem:[#allocation28_spill] sm:$0xff] }
 0x629   :  { %1400 = vmatpush1.bf16.msra.mxu0 %v2571_v28  ;;  %1441 = vmatpush1.bf16.msra.mxu1 %v2574_v62  ;;  %v1982_v28 = vld [vmem:[#allocation6] ss:$16 sps:$4 sm:$0xff]   ;;  %v1983_v62 = vld [vmem:[#allocation6 + $0x8] ss:$16 sps:$4 sm:$0xff]  }
 0x62a   :  { %1401 = vmatprep.subr.bf16.mxu0 %v2577_v48  ;;  %1442 = vmatprep.subr.bf16.mxu1 %v2580_v11  ;;  %v2811_v48 = vmov 0.0  }
 0x62b   :  { %1431 = vmatprep.mubr.bf16.mxu0 %v2798_v5  ;;  %1472 = vmatprep.mubr.bf16.mxu1 %v2798_v5  ;;  %v1976_v5 = vld [vmem:[#allocation6 + $0x24] ss:$16 sps:$4 sm:$0xff]  }
 0x62d   :  { %1402 = vmatpush1.bf16.msra.mxu0 %v2585_v59  ;;  %1443 = vmatpush1.bf16.msra.mxu1 %v2588_v2  ;;  %v2812_v2 = vld [vmem:[#allocation24_spill] sm:$0xff] }
 0x62e   :  { %1403 = vmatprep.subr.bf16.mxu0 %v2591_v13  ;;  %1444 = vmatprep.subr.bf16.mxu1 %v2594_v23 }
 0x631   :  { %1404 = vmatpush1.bf16.msra.mxu0 %v2597_v63  ;;  %1445 = vmatpush1.bf16.msra.mxu1 %v2600_v54 }
 0x632   :  { %1405 = vmatprep.subr.bf16.mxu0 %v2603_v6  ;;  %1446 = vmatprep.subr.bf16.mxu1 %v2606_v3  ;;  %v2813_v6 = vld [vmem:[#allocation26_spill] sm:$0xff] }
 0x635   :  { %1406 = vmatpush1.bf16.msra.mxu0 %v2609_v43  ;;  %1447 = vmatpush1.bf16.msra.mxu1 %v2612_v9 }
 0x636   :  { %1407 = vmatprep.subr.bf16.mxu0 %v2615_v56  ;;  %1448 = vmatprep.subr.bf16.mxu1 %v2618_v61 }
 0x639   :  { %1408 = vmatpush1.bf16.msra.mxu0 %v2621_v58  ;;  %1449 = vmatpush1.bf16.msra.mxu1 %v2624_v19  ;;  %v2814_v19 = vld [vmem:[#allocation25_spill] sm:$0xff] }
 0x63a   :  { %1409 = vmatprep.subr.bf16.mxu0 %v2627_v20  ;;  %1450 = vmatprep.subr.bf16.mxu1 %v2630_v21 }
 0x63d   :  { %1410 = vmatpush1.bf16.msra.mxu0 %v2633_v22  ;;  %1451 = vmatpush1.bf16.msra.mxu1 %v2636_v24  ;;  %v2815_v22 = vld [vmem:[#allocation27_spill] sm:$0xff] }
 0x63e   :  { %1411 = vmatprep.subr.bf16.mxu0 %v1976_v5  ;;  %1452 = vmatprep.subr.bf16.mxu1 %v1977_v12 }
 0x641   :  { %1412 = vmatpush1.bf16.msra.mxu0 %v1978_v7  ;;  %1453 = vmatpush1.bf16.msra.mxu1 %v1979_v14 }
 0x642   :  { %1413 = vmatprep.subr.bf16.mxu0 %v1980_v0  ;;  %1454 = vmatprep.subr.bf16.mxu1 %v1981_v15  ;;  %v2817_v0 = vld [vmem:[#allocation30_spill] sm:$0xff] }
 0x645   :  { %1414 = vmatpush1.bf16.msra.mxu0 %v1982_v28  ;;  %1455 = vmatpush1.bf16.msra.mxu1 %v1983_v62 }
 0x646   :  { %1727 = vmatprep.subr.mxu0 %v2811_v48 }
 0x6e8   :  { %v1317_v11 = vpop.f32.mrf.mxu0  ;;  %v1358_v59 = vpop.f32.mrf.mxu1 }
 0x6e9   :  { %v1365_v13 = vadd.f32 %v1317_v11, %v2812_v2  ;;  %v1367_v20 = vadd.f32 %v1358_v59, %v2814_v19 }
 0x6ea   :  { %v1319_v23 = vpop.f32.mrf.mxu0  ;;  %v1360_v63 = vpop.f32.mrf.mxu1 }
 0x6eb   :  { %v1703_v54 = vmul.f32 -1.442695, %v1365_v13  ;;  %v1366_v3 = vadd.f32 %v1319_v23, %v2813_v6  ;;  %v1705_v21 = vmul.f32 -1.442695, %v1367_v20  ;;  %v1368_v24 = vadd.f32 %v1360_v63, %v2815_v22  ;;  %v2818_v13 = vld [vmem:[#allocation29_spill] sm:$0xff] }
 0x6ec   :  { %v1321_v43 = vpop.f32.mrf.mxu0  ;;  %v1362_v9 = vpop.f32.mrf.mxu1 }
 0x6ed   :  { %1916 = vpow2.f32 %v1703_v54  ;;  %v1704_v56 = vmul.f32 -1.442695, %v1366_v3 }
 0x6ee   :  { %v1322_v61 = vpop.f32.mrf.mxu0  ;;  %v1363_v58 = vpop.f32.mrf.mxu1 }
 0x6ef   :  { %1918 = vpow2.f32 %v1704_v56 }
 0x6f0   :  { %1920 = vpow2.f32 %v1705_v21 }
 0x6f1   :  { %1922 = vtanh.f32 %v1368_v24 }
 0x6fa   :  { %v1917_v25 = vpop.eup %1916 }
 0x6fb   :  { %v1378_v44 = vadd.f32 1.0, %v1917_v25 }
 0x6fc   :  { %v1919_v26 = vpop.eup %1918 }
 0x6fd   :  { %1924 = vrcp.f32 %v1378_v44  ;;  %v1379_v45 = vadd.f32 1.0, %v1919_v26  ;;  %v1921_v27 = vpop.eup %1920  ;;  %v1709_v44 = vld [vmem:[%s2773_s5] ss:$0 sm:$0xff]  ;;  %s2059_s5 = smov [#allocation8]  }
 0x6fe   :  { %v1923_v46 = vpop.eup %1922  ;;  %v1380_v49 = vadd.f32 1.0, %v1921_v27  ;;  %s1623_s13 = sshll.u32 %s2059_s5, 4  ;;  %s1624_s13 = int_to_ptr.vmem [resolvable:$true] %s1623_s13 }
 0x6ff   :  { %1926 = vrcp.f32 %v1379_v45  ;;  %s2024_s14 = scalar_lea.vmem %s1624_s13, 128  ;;  %p2029_p11 = scmp.lt.s32.totalorder %s1624_s13, %s1624_s13 }
 0x700   :  { %1928 = vrcp.f32 %v1380_v49  ;;  %p2025_p10 = scmp.ne.s32.totalorder %s1624_s13, %s2024_s14  ;;  %p2030_p12 = scmp.lt.s32.totalorder %s2024_s14, %s2024_s14 }
 0x702   :  { %p2031_p13 = por %p2030_p12, %p2029_p11 }
 0x704   :  { %p2032_p0 = pnand %p2031_p13, %p2025_p10 }
 0x70a   :  { %v1925_v29 = vpop.eup %1924 }
 0x70b   :  { %v1389_v47 = vmul.f32 %v1925_v29, %v1923_v46 }
 0x70c   :  { %v1927_v30 = vpop.eup %1926 }
 0x70d   :  { %v1388_v31 = vmul.f32 %v1927_v30, %v2654_v10  ;;  %v1929_v51 = vpop.eup %1928  ;;  %v1510_v10 = vld [vmem:[%s2772_s4 + $0x8] sm:$0xff] }
 0x70f   :  { %v2687_v50 = vadd.f32 %v1389_v47, %v1388_v31 }
 0x711   :  { %1930 = vtanh.f32 %v2687_v50 }
 0x71e   :  { %v1931_v32 = vpop.eup %1930 }
 0x71f   :  { %v1392_v52 = vmul.f32 %v1931_v32, %v1929_v51 }
 0x721   :  { %v1398_v16 = vpack.c.bf16 %v1392_v52, %v1392_v52 }
 0x723   :  { %1432 = vmatmul.mubr.bf16.vlgmr.msra.gmra.mxu0 %v1398_v16  ;;  %1473 = vmatmul.mubr.bf16.vlgmr.msra.gmra.mxu1 %v1398_v16 }
 0x724   :  { %1728 = vmatpush3.msra.mxu0 %v1524_v34  ;;  %1759 = vmatprep.mubr.msk.f32.mxu0 %vm2058_vm2, %v2811_v48 }
 0x725   :  { %1729 = vmatprep.subr.mxu0 %v2811_v48 }
 0x726   :  { %1730 = vmatpush3.msra.mxu0 %v1523_v17 }
 0x727   :  { %1731 = vmatprep.subr.mxu0 %v2811_v48 }
 0x728   :  { %1732 = vmatpush3.msra.mxu0 %v1522_v35 }
 0x729   :  { %1733 = vmatprep.subr.mxu0 %v2811_v48 }
 0x72a   :  { %1734 = vmatpush3.msra.mxu0 %v1521_v36 }
 0x72b   :  { %1735 = vmatprep.subr.mxu0 %v2811_v48 }
 0x72c   :  { %1736 = vmatpush3.msra.mxu0 %v1520_v37 }
 0x72d   :  { %1737 = vmatprep.subr.mxu0 %v2811_v48 }
 0x72e   :  { %1738 = vmatpush3.msra.mxu0 %v1519_v39 }
 0x72f   :  { %1739 = vmatprep.subr.mxu0 %v2811_v48 }
 0x730   :  { %1740 = vmatpush3.msra.mxu0 %v1518_v40 }
 0x731   :  { %1741 = vmatprep.subr.mxu0 %v2811_v48 }
 0x732   :  { %1742 = vmatpush3.msra.mxu0 %v1517_v41 }
 0x733   :  { %1743 = vmatprep.subr.mxu0 %v2811_v48 }
 0x734   :  { %1744 = vmatpush3.msra.mxu0 %v1516_v42 }
 0x735   :  { %1745 = vmatprep.subr.mxu0 %v2811_v48 }
 0x736   :  { %1746 = vmatpush3.msra.mxu0 %v1515_v33 }
 0x737   :  { %1747 = vmatprep.subr.mxu0 %v2811_v48 }
 0x738   :  { %1748 = vmatpush3.msra.mxu0 %v1514_v4 }
 0x739   :  { %1749 = vmatprep.subr.mxu0 %v2811_v48 }
 0x73a   :  { %1750 = vmatpush3.msra.mxu0 %v1513_v18 }
 0x73b   :  { %1751 = vmatprep.subr.mxu0 %v2811_v48 }
 0x73c   :  { %1752 = vmatpush3.msra.mxu0 %v1512_v57 }
 0x73d   :  { %1753 = vmatprep.subr.mxu0 %v2811_v48 }
 0x73e   :  { %1754 = vmatpush3.msra.mxu0 %v1511_v55 }
 0x73f   :  { %1755 = vmatprep.subr.mxu0 %v2811_v48 }
 0x740   :  { %1756 = vmatpush3.msra.mxu0 %v1510_v10 }
 0x741   :  { %1757 = vmatprep.subr.mxu0 %v2811_v48 }
 0x742   :  { %1758 = vmatpush3.msra.mxu0 %v1509_v60 }
 0x7e3   :  { %v1433_v53 = vpop.f32.mrf.mxu0  ;;  %v1474_v8 = vpop.f32.mrf.mxu1 }
 0x7e4   :  { %v1481_v5 = vadd.f32 %v1433_v53, %v2816_v1  ;;  %v1483_v23 = vadd.f32 %v1474_v8, %v2818_v13 }
 0x7e5   :  { %v1435_v12 = vpop.f32.mrf.mxu0  ;;  %v1476_v7 = vpop.f32.mrf.mxu1 }
 0x7e6   :  { %v1706_v14 = vmul.f32 -1.442695, %v1481_v5  ;;  %v1482_v15 = vadd.f32 %v1435_v12, %v2817_v0  ;;  %v1708_v48 = vmul.f32 -1.442695, %v1483_v23  ;;  %v1484_v63 = vadd.f32 %v1476_v7, %v2388_v38 }
 0x7e7   :  { %v1437_v28 = vpop.f32.mrf.mxu0  ;;  %v1478_v62 = vpop.f32.mrf.mxu1 }
 0x7e8   :  { %1932 = vpow2.f32 %v1706_v14  ;;  %v1707_v11 = vmul.f32 -1.442695, %v1482_v15 }
 0x7e9   :  { %v1438_v59 = vpop.f32.mrf.mxu0  ;;  %v1479_v2 = vpop.f32.mrf.mxu1 }
 0x7ea   :  { %1934 = vpow2.f32 %v1707_v11 }
 0x7eb   :  { %1936 = vpow2.f32 %v1708_v48 }
 0x7ec   :  { %1938 = vtanh.f32 %v1484_v63 }
 0x7f5   :  { %v1933_v54 = vpop.eup %1932 }
 0x7f6   :  { %v1494_v6 = vadd.f32 1.0, %v1933_v54 }
 0x7f7   :  { %v1935_v3 = vpop.eup %1934 }
 0x7f8   :  { %1940 = vrcp.f32 %v1494_v6  ;;  %v1495_v43 = vadd.f32 1.0, %v1935_v3  ;;  %v1937_v9 = vpop.eup %1936 }
 0x7f9   :  { %v1939_v56 = vpop.eup %1938  ;;  %v1496_v20 = vadd.f32 1.0, %v1937_v9 }
 0x7fa   :  { %1942 = vrcp.f32 %v1495_v43 }
 0x7fb   :  { %1944 = vrcp.f32 %v1496_v20 }
 0x805   :  { %v1941_v61 = vpop.eup %1940 }
 0x806   :  { %v1505_v58 = vmul.f32 %v1941_v61, %v1939_v56 }
 0x807   :  { %v1943_v19 = vpop.eup %1942 }
 0x808   :  { %v1504_v21 = vmul.f32 %v1943_v19, %v2687_v50  ;;  %v1945_v38 = vpop.eup %1944 }
 0x80a   :  { %v1506_v22 = vadd.f32 %v1505_v58, %v1504_v21 }
 0x80c   :  { %1946 = vtanh.f32 %v1506_v22 }
 0x819   :  { %v1947_v24 = vpop.eup %1946 }
 0x81a   :  { %v1508_v25 = vmul.f32 %v1947_v24, %v1945_v38 }
 0x81c   :  { %1760 = vmatmul.mubr.f32.vlgmr.msra.gmra.mxu0 %v1508_v25 }
 0x8dc   :  { %v1598_v26 = vpop.f32.mrf.mxu0 }
 0x8dd   :  { %v1599_v45 = vadd.f32 %v1709_v44, %v1598_v26 }
 0x8de   :  { %v1761_v27 = vpop.f32.mrf.mxu0 }
 0x8df   :  { %v1603_v46 = vsel %vm1602_vm3, %v1599_v45, -inf }
 0x8e0   :  { %1604 = vmax.xlane.f32.xlu0 %v1603_v46 }
 0x969   :  { %v1605_v29 = vpop.xlane.xlu0 %1604 }
 0x96a   :  { %v1606_v47 = vsub.f32 %v1599_v45, %v1605_v29 }
 0x96c   :  { %v1607_v30 = vmul.f32 1.442695, %v1606_v47 }
 0x96e   :  { %1948 = vpow2.f32 %v1607_v30 }
 0x97b   :  { %v1949_v49 = vpop.eup %1948 }
 0x97c   :  { %v1609_v31 = vsel %vm1602_vm3, %v1949_v49, 0.0 }
 0x97d   :  { %1610 = vadd.xlane.f32.xlu0 %v1609_v31 }
 0xa06   :  { %v1611_v50 = vpop.xlane.xlu0 %1610 }
 0xa07   :  { %1950 = vlog2.f32 %v1611_v50 }
 0xa14   :  { %v1951_v51 = vpop.eup %1950 }
 0xa15   :  { %v1613_v32 = vmul.f32 0.6931472, %v1951_v51 }
 0xa17   :  { %v1614_v52 = vadd.f32 %v1613_v32, %v1605_v29 }
 0xa19   :  { %v1615_v16 = vsub.f32 %v1599_v45, %v1614_v52 }
 0xa1b   :  { %1616 = vst.msk [vmem:[#allocation8] sm:$0xff] %vm1602_vm3, %v1615_v16 }
 0xa1c   :  { %2035 = shalt.err (!%p2032_p0)
}
 0xa1d   :  { %1626 = dma.vmem_to_hbm [thread:$0]  %s1624_s13, 128, %s2774_s6, [#allocation5]  }
 0xa1e   :  { %2048 = dma.done.wait [#allocation5], 128  }
 0xa1f   :  { %2049 = vsyncadd [#allocation5], 4294967168 }
 0xa20   :  { %1630 = vsyncpa [#allocation4], 1 }
 0xa21   :  { %1631 = vsyncpa [#allocation7], 1 }
 0xa22   :  { %1632 = vsyncpa [#allocation5], 1 }

</bundles_post_ra>
